<compile_context>
chip_gen: v5e
topology: v5e:2x2
jax: 0.10.0
libtpu: 0.0.40
codegen_flags: <defaults>
</compile_context>

<pallas_src>
import jax
import jax.numpy as jnp
from jax.experimental import pallas as pl
from jax.experimental.pallas import tpu as pltpu

_LANE = 128


def _pad_lanes(n):
    return max(_LANE, ((n + _LANE - 1) // _LANE) * _LANE)


def _pick_tile(dim, preferred):
    """Largest preferred tile that evenly divides `dim`, else the full dim."""
    for t in preferred:
        if t <= dim and dim % t == 0:
            return t
    return dim


# ---------------------------------------------------------------------------
# Kernel 1: row-tiled linear   H[r, :] = X[r, :] @ W + b
# ---------------------------------------------------------------------------
def _linear_kernel(x_ref, w_ref, b_ref, o_ref):
    h = jnp.dot(x_ref[...], w_ref[...], preferred_element_type=jnp.float32)
    o_ref[...] = (h + b_ref[...]).astype(o_ref.dtype)


def _linear(x, w, b, *, out_dtype):
    R, Cin = x.shape
    Cout = w.shape[1]
    tr = _pick_tile(R, (1024, 512, 256, 128, 64, 32, 16, 8))
    return pl.pallas_call(
        _linear_kernel,
        out_shape=jax.ShapeDtypeStruct((R, Cout), out_dtype),
        grid=(R // tr,),
        in_specs=[
            pl.BlockSpec((tr, Cin), lambda r: (r, 0)),      # X rows
            pl.BlockSpec((Cin, Cout), lambda r: (0, 0)),    # W (resident)
            pl.BlockSpec((1, Cout), lambda r: (0, 0)),      # bias (resident)
        ],
        out_specs=pl.BlockSpec((tr, Cout), lambda r: (r, 0)),
        compiler_params=pltpu.CompilerParams(
            dimension_semantics=("parallel",),
            vmem_limit_bytes=48 * 1024 * 1024,
        ),
    )(x, w, b)


# ---------------------------------------------------------------------------
# Kernel 2: aggregation   out = A @ H    (A: (N, N), H: (N, Fw), Fw = B * Fp)
# ---------------------------------------------------------------------------
def _aggregate_kernel(a_ref, h_ref, o_ref, acc_ref):
    k = pl.program_id(2)

    @pl.when(k == 0)
    def _init():
        acc_ref[...] = jnp.zeros_like(acc_ref)

    acc_ref[...] += jnp.dot(a_ref[...], h_ref[...],
                            preferred_element_type=jnp.float32)

    @pl.when(k == pl.num_programs(2) - 1)
    def _finalize():
        o_ref[...] = acc_ref[...].astype(o_ref.dtype)


def _aggregate(A, H, *, tm=None, tk=None, tf=None, out_dtype):
    N = A.shape[0]
    Fw = H.shape[1]
    tm = tm or _pick_tile(N, (1024, 512, 256, 128, 64, 32, 16, 8))
    tk = tk or _pick_tile(N, (1024, 512, 256, 128))
    tf = tf or _pick_tile(Fw, (1024, 512, 256, 128))

    grid = (N // tm, Fw // tf, N // tk)
    cost = pl.CostEstimate(
        flops=int(2 * N * N * Fw),
        transcendentals=0,
        bytes_accessed=int(
            N * N * A.dtype.itemsize * (Fw // tf)      # A streamed once per j-tile
            + N * Fw * H.dtype.itemsize * (N // tm)    # H streamed once per m-tile
            + N * Fw * jnp.dtype(out_dtype).itemsize),
    )
    return pl.pallas_call(
        _aggregate_kernel,
        out_shape=jax.ShapeDtypeStruct((N, Fw), out_dtype),
        grid=grid,
        in_specs=[
            pl.BlockSpec((tm, tk), lambda m, j, k: (m, k)),   # A tile
            pl.BlockSpec((tk, tf), lambda m, j, k: (k, j)),   # H tile (wide RHS)
        ],
        out_specs=pl.BlockSpec((tm, tf), lambda m, j, k: (m, j)),
        scratch_shapes=[pltpu.VMEM((tm, tf), jnp.float32)],
        compiler_params=pltpu.CompilerParams(
            dimension_semantics=("parallel", "parallel", "arbitrary"),
            vmem_limit_bytes=48 * 1024 * 1024,
        ),
        cost_estimate=cost,
    )(A, H)


def gcn_forward(A_, X, W1, b1, W2, b2, *, tm=None, tk=None,
                compute_dtype=jnp.bfloat16):
    """out = A_ @ ((A_ @ (X @ W1 + b1)) @ W2 + b2)  (ReLU discarded, no dropout)."""
    squeeze = X.ndim == 2
    if squeeze:
        X = X[None]
    B, N, C = X.shape
    F_dim = W1.shape[1]
    K = W2.shape[1]

    # Zero-pad every feature (lane) dim to 128 -> lane-dense loads/stores.
    Cp, Fp, Kp = _pad_lanes(C), _pad_lanes(F_dim), _pad_lanes(K)
    W1p = jnp.pad(W1, ((0, Cp - C), (0, Fp - F_dim))).astype(compute_dtype)
    W2p = jnp.pad(W2, ((0, Fp - F_dim), (0, Kp - K))).astype(compute_dtype)
    b1p = jnp.pad(b1, (0, Fp - F_dim)).reshape(1, Fp).astype(jnp.float32)
    b2p = jnp.pad(b2, (0, Kp - K)).reshape(1, Kp).astype(jnp.float32)

    A_c = A_.astype(compute_dtype)

    # (B, N, C) -> (N, B, Cp) -> (N*B, Cp): one transpose up front; all later
    # reshapes between (N*B, F) and (N, B*F) are contiguous (free).
    Xp = jnp.pad(X, ((0, 0), (0, 0), (0, Cp - C))).astype(compute_dtype)
    Xr = jnp.transpose(Xp, (1, 0, 2)).reshape(N * B, Cp)

    # Layer 1:  H1 = X @ W1 + b1 (per graph), then G1 = A_ @ H1 with the batch
    # concatenated on the lane axis so A_ streams from HBM exactly once.
    H1 = _linear(Xr, W1p, b1p, out_dtype=compute_dtype)
    G1 = _aggregate(A_c, H1.reshape(N, B * Fp), tm=tm, tk=tk,
                    out_dtype=compute_dtype)
    # TODO(synk): the reference's ReLU output is assigned to a typo'd name and
    # discarded, and dropout is disabled (args.dropout=False), so neither is
    # applied here (matches the live data path of the PyTorch module).

    # Layer 2:  H2 = G1 @ W2 + b2, then G2 = A_ @ H2 (same shared-A layout).
    H2 = _linear(G1.reshape(N * B, Fp), W2p, b2p, out_dtype=compute_dtype)
    G2 = _aggregate(A_c, H2.reshape(N, B * Kp), tm=tm, tk=tk,
                    out_dtype=jnp.float32)

    out = G2.reshape(N, B, Kp).transpose(1, 0, 2)[:, :, :K]
    if squeeze:
        out = out[0]
    return out


def gcn_reference(A_, X, W1, b1, W2, b2):
    h = jnp.matmul(X, W1) + b1
    h = jnp.einsum("ij,bjf->bif", A_, h)
    h2 = jnp.matmul(h, W2) + b2
    return jnp.einsum("ij,bjk->bik", A_, h2)


if __name__ == "__main__":
    # Small, tile-friendly shapes; a batch of graphs shares one adjacency.
    B = 4            # graphs per call
    N = 128          # nodes per graph
    input_ch = 64    # node feature dim
    F_dim = 32       # hidden dim (args.F)
    class_num = 8    # number of classes

    key = jax.random.PRNGKey(0)
    k_a, k_x, k_w1, k_b1, k_w2, k_b2 = jax.random.split(key, 6)

    # D^-1/2 A D^-1/2 normalized adjacency (dense, symmetric).
    A_raw = jax.random.uniform(k_a, (N, N), dtype=jnp.float32)
    A_sym = 0.5 * (A_raw + A_raw.T)
    deg = jnp.sum(A_sym, axis=1)
    d_inv_sqrt = 1.0 / jnp.sqrt(deg)
    A_ = d_inv_sqrt[:, None] * A_sym * d_inv_sqrt[None, :]

    X = jax.random.normal(k_x, (B, N, input_ch), dtype=jnp.float32)
    # Weights stored (in_dim, out_dim); x @ W + b == PyTorch Linear(x).
    W1 = jax.random.normal(k_w1, (input_ch, F_dim), dtype=jnp.float32) * 0.1
    b1 = jax.random.normal(k_b1, (F_dim,), dtype=jnp.float32) * 0.1
    W2 = jax.random.normal(k_w2, (F_dim, class_num), dtype=jnp.float32) * 0.1
    b2 = jax.random.normal(k_b2, (class_num,), dtype=jnp.float32) * 0.1

    gcn_jit = jax.jit(gcn_forward, static_argnames=("tm", "tk", "compute_dtype"))
    ref = gcn_reference(A_, X, W1, b1, W2, b2)

    # bf16-MXU path (default): f32 accumulation, loosened tolerance.
    out = jax.block_until_ready(gcn_jit(A_, X, W1, b1, W2, b2))
    assert out.shape == (B, N, class_num)
    assert jnp.allclose(out, ref, atol=2e-2, rtol=2e-2)

    # f32 path: validates the layout / tiling structure without bf16 rounding.
    out_f32 = jax.block_until_ready(
        gcn_jit(A_, X, W1, b1, W2, b2, compute_dtype=jnp.float32))
    assert jnp.allclose(out_f32, ref, atol=1e-3, rtol=1e-3)

    print("KERNEL_OK")
</pallas_src>

<mosaic_0001>
module attributes {stable_mosaic.version = 11 : i64} {
  func.func @_aggregate_kernel(%arg0: i32, %arg1: i32, %arg2: i32, %arg3: memref<128x128xbf16, #tpu.memory_space<vmem>>, %arg4: memref<128x512xbf16, #tpu.memory_space<vmem>>, %arg5: memref<128x512xbf16, #tpu.memory_space<vmem>>, %arg6: memref<128x512xf32, #tpu.memory_space<vmem>>) attributes {dimension_semantics = [#tpu.dimension_semantics<parallel>, #tpu.dimension_semantics<parallel>, #tpu.dimension_semantics<arbitrary>], iteration_bounds = array<i64: 1, 1, 1>, scalar_prefetch = 0 : i64, scratch_operands = 1 : i64, tpu.core_type = #tpu.core_type<tc>, window_params = [{transform_indices = @transform_0, window_bounds = array<i64: 128, 128>}, {transform_indices = @transform_1, window_bounds = array<i64: 128, 512>}, {transform_indices = @transform_2, window_bounds = array<i64: 128, 512>}]} {
    %c0_i32 = arith.constant 0 : i32
    %0 = arith.cmpi eq, %arg2, %c0_i32 : i32
    %1 = arith.extui %0 : i1 to i32
    %c0_i32_0 = arith.constant 0 : i32
    %2 = arith.cmpi ne, %1, %c0_i32_0 : i32
    scf.if %2 {
      %cst_10 = arith.constant 0.000000e+00 : f32
      %12 = vector.broadcast %cst_10 : f32 to vector<128x512xf32>
      %c0_11 = arith.constant 0 : index
      %c0_12 = arith.constant 0 : index
      %13 = vector.load %arg6[%c0_11, %c0_12] : memref<128x512xf32, #tpu.memory_space<vmem>>, vector<128x512xf32>
      tpu.vector_store %arg6[%c0_11, %c0_12], %12 {strides = array<i32>} : memref<128x512xf32, #tpu.memory_space<vmem>>, vector<128x512xf32>,
    } else {
    }
    %c0 = arith.constant 0 : index
    %c0_1 = arith.constant 0 : index
    %3 = vector.load %arg6[%c0, %c0_1] : memref<128x512xf32, #tpu.memory_space<vmem>>, vector<128x512xf32>
    %c0_2 = arith.constant 0 : index
    %c0_3 = arith.constant 0 : index
    %4 = vector.load %arg3[%c0_2, %c0_3] : memref<128x128xbf16, #tpu.memory_space<vmem>>, vector<128x128xbf16>
    %c0_4 = arith.constant 0 : index
    %c0_5 = arith.constant 0 : index
    %5 = vector.load %arg4[%c0_4, %c0_5] : memref<128x512xbf16, #tpu.memory_space<vmem>>, vector<128x512xbf16>
    %cst = arith.constant dense<0.000000e+00> : vector<128x512xf32>
    %6 = tpu.matmul %4, %5, %cst {dimension_numbers = #tpu.dot_dimension_numbers<[1], [0], [0], [1], [0, 0, 1, 1], [], []>} : vector<128x128xbf16>, vector<128x512xbf16>, vector<128x512xf32> -> vector<128x512xf32>
    %7 = arith.addf %3, %6 : vector<128x512xf32>
    %c0_6 = arith.constant 0 : index
    %c0_7 = arith.constant 0 : index
    %8 = vector.load %arg6[%c0_6, %c0_7] : memref<128x512xf32, #tpu.memory_space<vmem>>, vector<128x512xf32>
    tpu.vector_store %arg6[%c0_6, %c0_7], %7 {strides = array<i32>} : memref<128x512xf32, #tpu.memory_space<vmem>>, vector<128x512xf32>,
    %c0_i32_8 = arith.constant 0 : i32
    %9 = arith.cmpi eq, %arg2, %c0_i32_8 : i32
    %10 = arith.extui %9 : i1 to i32
    %c0_i32_9 = arith.constant 0 : i32
    %11 = arith.cmpi ne, %10, %c0_i32_9 : i32
    scf.if %11 {
      %c0_10 = arith.constant 0 : index
      %c0_11 = arith.constant 0 : index
      %12 = vector.load %arg6[%c0_10, %c0_11] : memref<128x512xf32, #tpu.memory_space<vmem>>, vector<128x512xf32>
      %13 = arith.truncf %12 : vector<128x512xf32> to vector<128x512xbf16>
      %c0_12 = arith.constant 0 : index
      %c0_13 = arith.constant 0 : index
      %14 = vector.load %arg5[%c0_12, %c0_13] : memref<128x512xbf16, #tpu.memory_space<vmem>>, vector<128x512xbf16>
      tpu.vector_store %arg5[%c0_12, %c0_13], %13 {strides = array<i32>} : memref<128x512xbf16, #tpu.memory_space<vmem>>, vector<128x512xbf16>,
    } else {
    }
    return
  }
  func.func @transform_0(%arg0: i32, %arg1: i32, %arg2: i32) -> (i32, i32) {
    %c0_i32 = arith.constant 0 : i32
    return %arg0, %arg2 : i32, i32
  }
  func.func @transform_1(%arg0: i32, %arg1: i32, %arg2: i32) -> (i32, i32) {
    %c0_i32 = arith.constant 0 : i32
    return %arg2, %arg1 : i32, i32
  }
  func.func @transform_2(%arg0: i32, %arg1: i32, %arg2: i32) -> (i32, i32) {
    %c0_i32 = arith.constant 0 : i32
    return %arg0, %arg1 : i32, i32
  }
}

module attributes {stable_mosaic.version = 11 : i64} {
  func.func @_linear_kernel(%arg0: i32, %arg1: memref<512x128xbf16, #tpu.memory_space<vmem>>, %arg2: memref<128x128xbf16, #tpu.memory_space<vmem>>, %arg3: memref<1x128xf32, #tpu.memory_space<vmem>>, %arg4: memref<512x128xbf16, #tpu.memory_space<vmem>>) attributes {dimension_semantics = [#tpu.dimension_semantics<parallel>], iteration_bounds = array<i64: 1>, scalar_prefetch = 0 : i64, scratch_operands = 0 : i64, tpu.core_type = #tpu.core_type<tc>, window_params = [{transform_indices = @transform_0, window_bounds = array<i64: 512, 128>}, {pipeline_mode = #tpu.pipeline_mode<synchronous>, transform_indices = @transform_1, window_bounds = array<i64: 128, 128>}, {pipeline_mode = #tpu.pipeline_mode<synchronous>, transform_indices = @transform_2, window_bounds = array<i64: 1, 128>}, {transform_indices = @transform_3, window_bounds = array<i64: 512, 128>}]} {
    %c0 = arith.constant 0 : index
    %c0_0 = arith.constant 0 : index
    %0 = vector.load %arg1[%c0, %c0_0] : memref<512x128xbf16, #tpu.memory_space<vmem>>, vector<512x128xbf16>
    %c0_1 = arith.constant 0 : index
    %c0_2 = arith.constant 0 : index
    %1 = vector.load %arg2[%c0_1, %c0_2] : memref<128x128xbf16, #tpu.memory_space<vmem>>, vector<128x128xbf16>
    %cst = arith.constant dense<0.000000e+00> : vector<512x128xf32>
    %2 = tpu.matmul %0, %1, %cst {dimension_numbers = #tpu.dot_dimension_numbers<[1], [0], [0], [1], [0, 0, 1, 1], [], []>} : vector<512x128xbf16>, vector<128x128xbf16>, vector<512x128xf32> -> vector<512x128xf32>
    %c0_3 = arith.constant 0 : index
    %c0_4 = arith.constant 0 : index
    %3 = vector.load %arg3[%c0_3, %c0_4] : memref<1x128xf32, #tpu.memory_space<vmem>>, vector<1x128xf32>
    %4 = vector.broadcast %3 : vector<1x128xf32> to vector<512x128xf32>
    %5 = arith.addf %2, %4 : vector<512x128xf32>
    %6 = arith.truncf %5 : vector<512x128xf32> to vector<512x128xbf16>
    %c0_5 = arith.constant 0 : index
    %c0_6 = arith.constant 0 : index
    %7 = vector.load %arg4[%c0_5, %c0_6] : memref<512x128xbf16, #tpu.memory_space<vmem>>, vector<512x128xbf16>
    tpu.vector_store %arg4[%c0_5, %c0_6], %6 {strides = array<i32>} : memref<512x128xbf16, #tpu.memory_space<vmem>>, vector<512x128xbf16>,
    return
  }
  func.func @transform_0(%arg0: i32) -> (i32, i32) {
    %c0_i32 = arith.constant 0 : i32
    %c0_i32_0 = arith.constant 0 : i32
    return %arg0, %c0_i32 : i32, i32
  }
  func.func @transform_1(%arg0: i32) -> (i32, i32) {
    %c0_i32 = arith.constant 0 : i32
    %c0_i32_0 = arith.constant 0 : i32
    %c0_i32_1 = arith.constant 0 : i32
    return %c0_i32, %c0_i32_0 : i32, i32
  }
  func.func @transform_2(%arg0: i32) -> (i32, i32) {
    %c0_i32 = arith.constant 0 : i32
    %c0_i32_0 = arith.constant 0 : i32
    %c0_i32_1 = arith.constant 0 : i32
    return %c0_i32, %c0_i32_0 : i32, i32
  }
  func.func @transform_3(%arg0: i32) -> (i32, i32) {
    %c0_i32 = arith.constant 0 : i32
    %c0_i32_0 = arith.constant 0 : i32
    return %arg0, %c0_i32 : i32, i32
  }
}

module attributes {stable_mosaic.version = 11 : i64} {
  func.func @_aggregate_kernel(%arg0: i32, %arg1: i32, %arg2: i32, %arg3: memref<128x128xbf16, #tpu.memory_space<vmem>>, %arg4: memref<128x512xbf16, #tpu.memory_space<vmem>>, %arg5: memref<128x512xf32, #tpu.memory_space<vmem>>, %arg6: memref<128x512xf32, #tpu.memory_space<vmem>>) attributes {dimension_semantics = [#tpu.dimension_semantics<parallel>, #tpu.dimension_semantics<parallel>, #tpu.dimension_semantics<arbitrary>], iteration_bounds = array<i64: 1, 1, 1>, scalar_prefetch = 0 : i64, scratch_operands = 1 : i64, tpu.core_type = #tpu.core_type<tc>, window_params = [{transform_indices = @transform_0, window_bounds = array<i64: 128, 128>}, {transform_indices = @transform_1, window_bounds = array<i64: 128, 512>}, {transform_indices = @transform_2, window_bounds = array<i64: 128, 512>}]} {
    %c0_i32 = arith.constant 0 : i32
    %0 = arith.cmpi eq, %arg2, %c0_i32 : i32
    %1 = arith.extui %0 : i1 to i32
    %c0_i32_0 = arith.constant 0 : i32
    %2 = arith.cmpi ne, %1, %c0_i32_0 : i32
    scf.if %2 {
      %cst_10 = arith.constant 0.000000e+00 : f32
      %12 = vector.broadcast %cst_10 : f32 to vector<128x512xf32>
      %c0_11 = arith.constant 0 : index
      %c0_12 = arith.constant 0 : index
      %13 = vector.load %arg6[%c0_11, %c0_12] : memref<128x512xf32, #tpu.memory_space<vmem>>, vector<128x512xf32>
      tpu.vector_store %arg6[%c0_11, %c0_12], %12 {strides = array<i32>} : memref<128x512xf32, #tpu.memory_space<vmem>>, vector<128x512xf32>,
    } else {
    }
    %c0 = arith.constant 0 : index
    %c0_1 = arith.constant 0 : index
    %3 = vector.load %arg6[%c0, %c0_1] : memref<128x512xf32, #tpu.memory_space<vmem>>, vector<128x512xf32>
    %c0_2 = arith.constant 0 : index
    %c0_3 = arith.constant 0 : index
    %4 = vector.load %arg3[%c0_2, %c0_3] : memref<128x128xbf16, #tpu.memory_space<vmem>>, vector<128x128xbf16>
    %c0_4 = arith.constant 0 : index
    %c0_5 = arith.constant 0 : index
    %5 = vector.load %arg4[%c0_4, %c0_5] : memref<128x512xbf16, #tpu.memory_space<vmem>>, vector<128x512xbf16>
    %cst = arith.constant dense<0.000000e+00> : vector<128x512xf32>
    %6 = tpu.matmul %4, %5, %cst {dimension_numbers = #tpu.dot_dimension_numbers<[1], [0], [0], [1], [0, 0, 1, 1], [], []>} : vector<128x128xbf16>, vector<128x512xbf16>, vector<128x512xf32> -> vector<128x512xf32>
    %7 = arith.addf %3, %6 : vector<128x512xf32>
    %c0_6 = arith.constant 0 : index
    %c0_7 = arith.constant 0 : index
    %8 = vector.load %arg6[%c0_6, %c0_7] : memref<128x512xf32, #tpu.memory_space<vmem>>, vector<128x512xf32>
    tpu.vector_store %arg6[%c0_6, %c0_7], %7 {strides = array<i32>} : memref<128x512xf32, #tpu.memory_space<vmem>>, vector<128x512xf32>,
    %c0_i32_8 = arith.constant 0 : i32
    %9 = arith.cmpi eq, %arg2, %c0_i32_8 : i32
    %10 = arith.extui %9 : i1 to i32
    %c0_i32_9 = arith.constant 0 : i32
    %11 = arith.cmpi ne, %10, %c0_i32_9 : i32
    scf.if %11 {
      %c0_10 = arith.constant 0 : index
      %c0_11 = arith.constant 0 : index
      %12 = vector.load %arg6[%c0_10, %c0_11] : memref<128x512xf32, #tpu.memory_space<vmem>>, vector<128x512xf32>
      %c0_12 = arith.constant 0 : index
      %c0_13 = arith.constant 0 : index
      %13 = vector.load %arg5[%c0_12, %c0_13] : memref<128x512xf32, #tpu.memory_space<vmem>>, vector<128x512xf32>
      tpu.vector_store %arg5[%c0_12, %c0_13], %12 {strides = array<i32>} : memref<128x512xf32, #tpu.memory_space<vmem>>, vector<128x512xf32>,
    } else {
    }
    return
  }
  func.func @transform_0(%arg0: i32, %arg1: i32, %arg2: i32) -> (i32, i32) {
    %c0_i32 = arith.constant 0 : i32
    return %arg0, %arg2 : i32, i32
  }
  func.func @transform_1(%arg0: i32, %arg1: i32, %arg2: i32) -> (i32, i32) {
    %c0_i32 = arith.constant 0 : i32
    return %arg2, %arg1 : i32, i32
  }
  func.func @transform_2(%arg0: i32, %arg1: i32, %arg2: i32) -> (i32, i32) {
    %c0_i32 = arith.constant 0 : i32
    return %arg0, %arg1 : i32, i32
  }
}

</mosaic_0001>

<bundles_post_ra>
// kernel: gcn_forward.4
= control target key start
LH: loop header
LB: loop body
LE: loop exit
PB: predicated region body
PF: predicated region fallthrough
CT: control target
= control target key end

     0   :  { %s1360_s1 = inlined_call_operand.vmem [shape: bf16[128,128], index: 1, kind: input, shape index: {}]   ;;  %s1361_s2 = inlined_call_operand.vmem [shape: f32[1,128], index: 2, kind: input, shape index: {}]   ;;  %s1362_s0 = inlined_call_operand.vmem [shape: bf16[512,128], index: 0, kind: input, shape index: {}]   ;;  %s1363_s3 = inlined_call_operand.vmem [shape: bf16[512,128], index: 3, kind: output, shape index: {}]  }
   0x1   :  { %v838_v0 = vld [vmem:[%s1360_s1 + $0x38] sm:$0xff]  ;;  %v837_v1 = vld [vmem:[%s1360_s1 + $0x30] sm:$0xff]  ;;  %v836_v2 = vld [vmem:[%s1360_s1 + $0x28] sm:$0xff] }
   0x2   :  { %338 = vmatpush.bf16.msra.mxu0 %v838_v0  ;;  %1030 = vmatpush.bf16.msra.mxu1 %v838_v0  ;;  %v835_v3 = vld [vmem:[%s1360_s1 + $0x20] sm:$0xff]  ;;  %v834_v4 = vld [vmem:[%s1360_s1 + $0x18] sm:$0xff]  ;;  %v833_v5 = vld [vmem:[%s1360_s1 + $0x10] sm:$0xff] }
   0x3   :  { %1031 = vmatpush.bf16.msra.mxu2 %v838_v0  ;;  %1032 = vmatpush.bf16.msra.mxu3 %v838_v0  ;;  %v832_v6 = vld [vmem:[%s1360_s1 + $0x8] sm:$0xff]  ;;  %v831_v7 = vld [vmem:[%s1360_s1] sm:$0xff]  ;;  %v801_v16 = vld [vmem:[%s1362_s0 + $0x10] sm:$0xff] }
   0x4   :  { %v799_v8 = vld [vmem:[%s1362_s0] sm:$0xff]  ;;  %v800_v12 = vld [vmem:[%s1362_s0 + $0x8] sm:$0xff]  ;;  %v809_v17 = vld [vmem:[%s1362_s0 + $0x50] sm:$0xff] }
   0x5   :  { %v807_v9 = vld [vmem:[%s1362_s0 + $0x40] sm:$0xff]  ;;  %v808_v13 = vld [vmem:[%s1362_s0 + $0x48] sm:$0xff]  ;;  %v817_v18 = vld [vmem:[%s1362_s0 + $0x90] sm:$0xff] }
   0x6   :  { %339 = vmatpush.bf16.msra.mxu0 %v837_v1  ;;  %1033 = vmatpush.bf16.msra.mxu1 %v837_v1  ;;  %v815_v10 = vld [vmem:[%s1362_s0 + $0x80] sm:$0xff]  ;;  %v816_v14 = vld [vmem:[%s1362_s0 + $0x88] sm:$0xff]  ;;  %v825_v19 = vld [vmem:[%s1362_s0 + $0xd0] sm:$0xff] }
   0x7   :  { %1034 = vmatpush.bf16.msra.mxu2 %v837_v1  ;;  %1035 = vmatpush.bf16.msra.mxu3 %v837_v1  ;;  %v823_v11 = vld [vmem:[%s1362_s0 + $0xc0] sm:$0xff]  ;;  %v824_v15 = vld [vmem:[%s1362_s0 + $0xc8] sm:$0xff]  ;;  %v802_v20 = vld [vmem:[%s1362_s0 + $0x18] sm:$0xff] }
   0x8   :  { %v810_v21 = vld [vmem:[%s1362_s0 + $0x58] sm:$0xff]  ;;  %v803_v24 = vld [vmem:[%s1362_s0 + $0x20] sm:$0xff]  ;;  %v804_v28 = vld [vmem:[%s1362_s0 + $0x28] sm:$0xff] }
   0x9   :  { %v818_v22 = vld [vmem:[%s1362_s0 + $0x98] sm:$0xff]  ;;  %v811_v25 = vld [vmem:[%s1362_s0 + $0x60] sm:$0xff]  ;;  %v812_v29 = vld [vmem:[%s1362_s0 + $0x68] sm:$0xff] }
   0xa   :  { %340 = vmatpush.bf16.msra.mxu0 %v836_v2  ;;  %1036 = vmatpush.bf16.msra.mxu1 %v836_v2  ;;  %v826_v23 = vld [vmem:[%s1362_s0 + $0xd8] sm:$0xff]  ;;  %v819_v26 = vld [vmem:[%s1362_s0 + $0xa0] sm:$0xff]  ;;  %v820_v30 = vld [vmem:[%s1362_s0 + $0xa8] sm:$0xff] }
   0xb   :  { %1037 = vmatpush.bf16.msra.mxu2 %v836_v2  ;;  %1038 = vmatpush.bf16.msra.mxu3 %v836_v2  ;;  %v827_v27 = vld [vmem:[%s1362_s0 + $0xe0] sm:$0xff]  ;;  %v828_v31 = vld [vmem:[%s1362_s0 + $0xe8] sm:$0xff]  ;;  %v805_v32 = vld [vmem:[%s1362_s0 + $0x30] sm:$0xff] }
   0xc   :  { %v813_v33 = vld [vmem:[%s1362_s0 + $0x70] sm:$0xff]  ;;  %v806_v36 = vld [vmem:[%s1362_s0 + $0x38] sm:$0xff]  ;;  %v1198_v42 = vld [vmem:[%s1361_s2] ss:$0 sm:$0xff] }
   0xd   :  { %v821_v34 = vld [vmem:[%s1362_s0 + $0xb0] sm:$0xff]  ;;  %v814_v37 = vld [vmem:[%s1362_s0 + $0x78] sm:$0xff] }
   0xe   :  { %341 = vmatpush.bf16.msra.mxu0 %v835_v3  ;;  %1039 = vmatpush.bf16.msra.mxu1 %v835_v3  ;;  %v829_v35 = vld [vmem:[%s1362_s0 + $0xf0] sm:$0xff]  ;;  %v822_v38 = vld [vmem:[%s1362_s0 + $0xb8] sm:$0xff] }
   0xf   :  { %1040 = vmatpush.bf16.msra.mxu2 %v835_v3  ;;  %1041 = vmatpush.bf16.msra.mxu3 %v835_v3  ;;  %v830_v39 = vld [vmem:[%s1362_s0 + $0xf8] sm:$0xff] }
  0x12   :  { %342 = vmatpush.bf16.msra.mxu0 %v834_v4  ;;  %1042 = vmatpush.bf16.msra.mxu1 %v834_v4 }
  0x13   :  { %1043 = vmatpush.bf16.msra.mxu2 %v834_v4  ;;  %1044 = vmatpush.bf16.msra.mxu3 %v834_v4 }
  0x16   :  { %343 = vmatpush.bf16.msra.mxu0 %v833_v5  ;;  %1045 = vmatpush.bf16.msra.mxu1 %v833_v5 }
  0x17   :  { %1046 = vmatpush.bf16.msra.mxu2 %v833_v5  ;;  %1047 = vmatpush.bf16.msra.mxu3 %v833_v5 }
  0x1a   :  { %344 = vmatpush.bf16.msra.mxu0 %v832_v6  ;;  %1048 = vmatpush.bf16.msra.mxu1 %v832_v6 }
  0x1b   :  { %1049 = vmatpush.bf16.msra.mxu2 %v832_v6  ;;  %1050 = vmatpush.bf16.msra.mxu3 %v832_v6 }
  0x1e   :  { %345 = vmatpush.bf16.msra.mxu0 %v831_v7  ;;  %1051 = vmatpush.bf16.msra.mxu1 %v831_v7 }
  0x1f   :  { %1052 = vmatpush.bf16.msra.mxu2 %v831_v7  ;;  %1053 = vmatpush.bf16.msra.mxu3 %v831_v7 }
  0x21   :  { %346 = vmatmul.bf16.vlgmr.msra.gmra.mxu0 %v799_v8  ;;  %386 = vmatmul.bf16.vlgmr.msra.gmra.mxu1 %v807_v9 }
  0x22   :  { %426 = vmatmul.bf16.vlgmr.msra.gmra.mxu2 %v815_v10  ;;  %466 = vmatmul.bf16.vlgmr.msra.gmra.mxu3 %v823_v11 }
  0x31   :  { %351 = vmatmul.bf16.gmra.mxu0 %v800_v12  ;;  %391 = vmatmul.bf16.gmra.mxu1 %v808_v13 }
  0x32   :  { %431 = vmatmul.bf16.gmra.mxu2 %v816_v14  ;;  %471 = vmatmul.bf16.gmra.mxu3 %v824_v15 }
  0x41   :  { %356 = vmatmul.bf16.gmra.mxu0 %v801_v16  ;;  %396 = vmatmul.bf16.gmra.mxu1 %v809_v17 }
  0x42   :  { %436 = vmatmul.bf16.gmra.mxu2 %v817_v18  ;;  %476 = vmatmul.bf16.gmra.mxu3 %v825_v19 }
  0x51   :  { %361 = vmatmul.bf16.gmra.mxu0 %v802_v20  ;;  %401 = vmatmul.bf16.gmra.mxu1 %v810_v21 }
  0x52   :  { %441 = vmatmul.bf16.gmra.mxu2 %v818_v22  ;;  %481 = vmatmul.bf16.gmra.mxu3 %v826_v23 }
  0x61   :  { %366 = vmatmul.bf16.gmra.mxu0 %v803_v24  ;;  %406 = vmatmul.bf16.gmra.mxu1 %v811_v25 }
  0x62   :  { %446 = vmatmul.bf16.gmra.mxu2 %v819_v26  ;;  %486 = vmatmul.bf16.gmra.mxu3 %v827_v27 }
  0x71   :  { %371 = vmatmul.bf16.gmra.mxu0 %v804_v28  ;;  %411 = vmatmul.bf16.gmra.mxu1 %v812_v29 }
  0x72   :  { %451 = vmatmul.bf16.gmra.mxu2 %v820_v30  ;;  %491 = vmatmul.bf16.gmra.mxu3 %v828_v31 }
  0x81   :  { %376 = vmatmul.bf16.gmra.mxu0 %v805_v32  ;;  %416 = vmatmul.bf16.gmra.mxu1 %v813_v33 }
  0x82   :  { %456 = vmatmul.bf16.gmra.mxu2 %v821_v34  ;;  %496 = vmatmul.bf16.gmra.mxu3 %v829_v35 }
  0x91   :  { %381 = vmatmul.bf16.gmra.mxu0 %v806_v36  ;;  %421 = vmatmul.bf16.gmra.mxu1 %v814_v37 }
  0x92   :  { %461 = vmatmul.bf16.gmra.mxu2 %v822_v38  ;;  %501 = vmatmul.bf16.gmra.mxu3 %v830_v39 }
  0x9e   :  { %v347_v40 = vpop.f32.mrf.mxu0  ;;  %v387_v41 = vpop.f32.mrf.mxu1 }
  0x9f   :  { %v348_v47 = vadd.f32 %v1198_v42, %v347_v40  ;;  %v388_v48 = vadd.f32 %v1198_v42, %v387_v41 }
  0xa5   :  { %v427_v43 = vpop.f32.mrf.mxu2  ;;  %v467_v44 = vpop.f32.mrf.mxu3 }
  0xa6   :  { %v349_v45 = vpop.f32.mrf.mxu0  ;;  %v389_v46 = vpop.f32.mrf.mxu1  ;;  %v428_v55 = vadd.f32 %v1198_v42, %v427_v43  ;;  %v468_v56 = vadd.f32 %v1198_v42, %v467_v44 }
  0xa7   :  { %v350_v49 = vadd.f32 %v1198_v42, %v349_v45  ;;  %v390_v50 = vadd.f32 %v1198_v42, %v389_v46 }
  0xa9   :  { %v842_v51 = vpack.c.bf16 %v350_v49, %v348_v47  ;;  %v882_v52 = vpack.c.bf16 %v390_v50, %v388_v48 }
  0xab   :  { %843 = vst [vmem:[%s1363_s3] sm:$0xff] %v842_v51  }
  0xac   :  { %1006 = vst [vmem:[%s1363_s3 + $0x40] sm:$0xff] %v882_v52  }
  0xad   :  { %v429_v53 = vpop.f32.mrf.mxu2  ;;  %v469_v54 = vpop.f32.mrf.mxu3 }
  0xae   :  { %v430_v57 = vadd.f32 %v1198_v42, %v429_v53  ;;  %v470_v58 = vadd.f32 %v1198_v42, %v469_v54  ;;  %v352_v59 = vpop.f32.mrf.mxu0  ;;  %v392_v60 = vpop.f32.mrf.mxu1 }
  0xaf   :  { %v353_v3 = vadd.f32 %v1198_v42, %v352_v59  ;;  %v393_v4 = vadd.f32 %v1198_v42, %v392_v60 }
  0xb0   :  { %v922_v61 = vpack.c.bf16 %v430_v57, %v428_v55  ;;  %v962_v62 = vpack.c.bf16 %v470_v58, %v468_v56 }
  0xb2   :  { %1014 = vst [vmem:[%s1363_s3 + $0x80] sm:$0xff] %v922_v61  }
  0xb3   :  { %1022 = vst [vmem:[%s1363_s3 + $0xc0] sm:$0xff] %v962_v62  }
  0xb5   :  { %v432_v63 = vpop.f32.mrf.mxu2  ;;  %v472_v0 = vpop.f32.mrf.mxu3 }
  0xb6   :  { %v354_v1 = vpop.f32.mrf.mxu0  ;;  %v394_v2 = vpop.f32.mrf.mxu1  ;;  %v433_v11 = vadd.f32 %v1198_v42, %v432_v63  ;;  %v473_v12 = vadd.f32 %v1198_v42, %v472_v0 }
  0xb7   :  { %v355_v5 = vadd.f32 %v1198_v42, %v354_v1  ;;  %v395_v6 = vadd.f32 %v1198_v42, %v394_v2 }
  0xb9   :  { %v847_v7 = vpack.c.bf16 %v355_v5, %v353_v3  ;;  %v887_v8 = vpack.c.bf16 %v395_v6, %v393_v4 }
  0xbb   :  { %999 = vst [vmem:[%s1363_s3 + $0x8] sm:$0xff] %v847_v7  }
  0xbc   :  { %1007 = vst [vmem:[%s1363_s3 + $0x48] sm:$0xff] %v887_v8  }
  0xbd   :  { %v434_v9 = vpop.f32.mrf.mxu2  ;;  %v474_v10 = vpop.f32.mrf.mxu3 }
  0xbe   :  { %v435_v13 = vadd.f32 %v1198_v42, %v434_v9  ;;  %v475_v14 = vadd.f32 %v1198_v42, %v474_v10  ;;  %v357_v15 = vpop.f32.mrf.mxu0  ;;  %v397_v16 = vpop.f32.mrf.mxu1 }
  0xbf   :  { %v358_v23 = vadd.f32 %v1198_v42, %v357_v15  ;;  %v398_v24 = vadd.f32 %v1198_v42, %v397_v16 }
  0xc0   :  { %v927_v17 = vpack.c.bf16 %v435_v13, %v433_v11  ;;  %v967_v18 = vpack.c.bf16 %v475_v14, %v473_v12 }
  0xc2   :  { %1015 = vst [vmem:[%s1363_s3 + $0x88] sm:$0xff] %v927_v17  }
  0xc3   :  { %1023 = vst [vmem:[%s1363_s3 + $0xc8] sm:$0xff] %v967_v18  }
  0xc5   :  { %v437_v19 = vpop.f32.mrf.mxu2  ;;  %v477_v20 = vpop.f32.mrf.mxu3 }
  0xc6   :  { %v359_v21 = vpop.f32.mrf.mxu0  ;;  %v399_v22 = vpop.f32.mrf.mxu1  ;;  %v438_v31 = vadd.f32 %v1198_v42, %v437_v19  ;;  %v478_v32 = vadd.f32 %v1198_v42, %v477_v20 }
  0xc7   :  { %v360_v25 = vadd.f32 %v1198_v42, %v359_v21  ;;  %v400_v26 = vadd.f32 %v1198_v42, %v399_v22 }
  0xc9   :  { %v852_v27 = vpack.c.bf16 %v360_v25, %v358_v23  ;;  %v892_v28 = vpack.c.bf16 %v400_v26, %v398_v24 }
  0xcb   :  { %1000 = vst [vmem:[%s1363_s3 + $0x10] sm:$0xff] %v852_v27  }
  0xcc   :  { %1008 = vst [vmem:[%s1363_s3 + $0x50] sm:$0xff] %v892_v28  }
  0xcd   :  { %v439_v29 = vpop.f32.mrf.mxu2  ;;  %v479_v30 = vpop.f32.mrf.mxu3 }
  0xce   :  { %v440_v33 = vadd.f32 %v1198_v42, %v439_v29  ;;  %v480_v34 = vadd.f32 %v1198_v42, %v479_v30  ;;  %v362_v35 = vpop.f32.mrf.mxu0  ;;  %v402_v36 = vpop.f32.mrf.mxu1 }
  0xcf   :  { %v363_v44 = vadd.f32 %v1198_v42, %v362_v35  ;;  %v403_v45 = vadd.f32 %v1198_v42, %v402_v36 }
  0xd0   :  { %v932_v37 = vpack.c.bf16 %v440_v33, %v438_v31  ;;  %v972_v38 = vpack.c.bf16 %v480_v34, %v478_v32 }
  0xd2   :  { %1016 = vst [vmem:[%s1363_s3 + $0x90] sm:$0xff] %v932_v37  }
  0xd3   :  { %1024 = vst [vmem:[%s1363_s3 + $0xd0] sm:$0xff] %v972_v38  }
  0xd5   :  { %v442_v39 = vpop.f32.mrf.mxu2  ;;  %v482_v40 = vpop.f32.mrf.mxu3 }
  0xd6   :  { %v364_v41 = vpop.f32.mrf.mxu0  ;;  %v404_v43 = vpop.f32.mrf.mxu1  ;;  %v443_v52 = vadd.f32 %v1198_v42, %v442_v39  ;;  %v483_v53 = vadd.f32 %v1198_v42, %v482_v40 }
  0xd7   :  { %v365_v46 = vadd.f32 %v1198_v42, %v364_v41  ;;  %v405_v47 = vadd.f32 %v1198_v42, %v404_v43 }
  0xd9   :  { %v857_v48 = vpack.c.bf16 %v365_v46, %v363_v44  ;;  %v897_v49 = vpack.c.bf16 %v405_v47, %v403_v45 }
  0xdb   :  { %1001 = vst [vmem:[%s1363_s3 + $0x18] sm:$0xff] %v857_v48  }
  0xdc   :  { %1009 = vst [vmem:[%s1363_s3 + $0x58] sm:$0xff] %v897_v49  }
  0xdd   :  { %v444_v50 = vpop.f32.mrf.mxu2  ;;  %v484_v51 = vpop.f32.mrf.mxu3 }
  0xde   :  { %v445_v54 = vadd.f32 %v1198_v42, %v444_v50  ;;  %v485_v55 = vadd.f32 %v1198_v42, %v484_v51  ;;  %v367_v56 = vpop.f32.mrf.mxu0  ;;  %v407_v57 = vpop.f32.mrf.mxu1 }
  0xdf   :  { %v368_v0 = vadd.f32 %v1198_v42, %v367_v56  ;;  %v408_v1 = vadd.f32 %v1198_v42, %v407_v57 }
  0xe0   :  { %v937_v58 = vpack.c.bf16 %v445_v54, %v443_v52  ;;  %v977_v59 = vpack.c.bf16 %v485_v55, %v483_v53 }
  0xe2   :  { %1017 = vst [vmem:[%s1363_s3 + $0x98] sm:$0xff] %v937_v58  }
  0xe3   :  { %1025 = vst [vmem:[%s1363_s3 + $0xd8] sm:$0xff] %v977_v59  }
  0xe5   :  { %v447_v60 = vpop.f32.mrf.mxu2  ;;  %v487_v61 = vpop.f32.mrf.mxu3 }
  0xe6   :  { %v369_v62 = vpop.f32.mrf.mxu0  ;;  %v409_v63 = vpop.f32.mrf.mxu1  ;;  %v448_v8 = vadd.f32 %v1198_v42, %v447_v60  ;;  %v488_v9 = vadd.f32 %v1198_v42, %v487_v61 }
  0xe7   :  { %v370_v2 = vadd.f32 %v1198_v42, %v369_v62  ;;  %v410_v3 = vadd.f32 %v1198_v42, %v409_v63 }
  0xe9   :  { %v862_v4 = vpack.c.bf16 %v370_v2, %v368_v0  ;;  %v902_v5 = vpack.c.bf16 %v410_v3, %v408_v1 }
  0xeb   :  { %1002 = vst [vmem:[%s1363_s3 + $0x20] sm:$0xff] %v862_v4  }
  0xec   :  { %1010 = vst [vmem:[%s1363_s3 + $0x60] sm:$0xff] %v902_v5  }
  0xed   :  { %v449_v6 = vpop.f32.mrf.mxu2  ;;  %v489_v7 = vpop.f32.mrf.mxu3 }
  0xee   :  { %v450_v10 = vadd.f32 %v1198_v42, %v449_v6  ;;  %v490_v11 = vadd.f32 %v1198_v42, %v489_v7  ;;  %v372_v12 = vpop.f32.mrf.mxu0  ;;  %v412_v13 = vpop.f32.mrf.mxu1 }
  0xef   :  { %v373_v20 = vadd.f32 %v1198_v42, %v372_v12  ;;  %v413_v21 = vadd.f32 %v1198_v42, %v412_v13 }
  0xf0   :  { %v942_v14 = vpack.c.bf16 %v450_v10, %v448_v8  ;;  %v982_v15 = vpack.c.bf16 %v490_v11, %v488_v9 }
  0xf2   :  { %1018 = vst [vmem:[%s1363_s3 + $0xa0] sm:$0xff] %v942_v14  }
  0xf3   :  { %1026 = vst [vmem:[%s1363_s3 + $0xe0] sm:$0xff] %v982_v15  }
  0xf5   :  { %v452_v16 = vpop.f32.mrf.mxu2  ;;  %v492_v17 = vpop.f32.mrf.mxu3 }
  0xf6   :  { %v374_v18 = vpop.f32.mrf.mxu0  ;;  %v414_v19 = vpop.f32.mrf.mxu1  ;;  %v453_v28 = vadd.f32 %v1198_v42, %v452_v16  ;;  %v493_v29 = vadd.f32 %v1198_v42, %v492_v17 }
  0xf7   :  { %v375_v22 = vadd.f32 %v1198_v42, %v374_v18  ;;  %v415_v23 = vadd.f32 %v1198_v42, %v414_v19 }
  0xf9   :  { %v867_v24 = vpack.c.bf16 %v375_v22, %v373_v20  ;;  %v907_v25 = vpack.c.bf16 %v415_v23, %v413_v21 }
  0xfb   :  { %1003 = vst [vmem:[%s1363_s3 + $0x28] sm:$0xff] %v867_v24  }
  0xfc   :  { %1011 = vst [vmem:[%s1363_s3 + $0x68] sm:$0xff] %v907_v25  }
  0xfd   :  { %v454_v26 = vpop.f32.mrf.mxu2  ;;  %v494_v27 = vpop.f32.mrf.mxu3 }
  0xfe   :  { %v455_v30 = vadd.f32 %v1198_v42, %v454_v26  ;;  %v495_v31 = vadd.f32 %v1198_v42, %v494_v27  ;;  %v377_v32 = vpop.f32.mrf.mxu0  ;;  %v417_v33 = vpop.f32.mrf.mxu1 }
  0xff   :  { %v378_v40 = vadd.f32 %v1198_v42, %v377_v32  ;;  %v418_v41 = vadd.f32 %v1198_v42, %v417_v33 }
 0x100   :  { %v947_v34 = vpack.c.bf16 %v455_v30, %v453_v28  ;;  %v987_v35 = vpack.c.bf16 %v495_v31, %v493_v29 }
 0x102   :  { %1019 = vst [vmem:[%s1363_s3 + $0xa8] sm:$0xff] %v947_v34  }
 0x103   :  { %1027 = vst [vmem:[%s1363_s3 + $0xe8] sm:$0xff] %v987_v35  }
 0x105   :  { %v457_v36 = vpop.f32.mrf.mxu2  ;;  %v497_v37 = vpop.f32.mrf.mxu3 }
 0x106   :  { %v379_v38 = vpop.f32.mrf.mxu0  ;;  %v419_v39 = vpop.f32.mrf.mxu1  ;;  %v458_v49 = vadd.f32 %v1198_v42, %v457_v36  ;;  %v498_v50 = vadd.f32 %v1198_v42, %v497_v37 }
 0x107   :  { %v380_v43 = vadd.f32 %v1198_v42, %v379_v38  ;;  %v420_v44 = vadd.f32 %v1198_v42, %v419_v39 }
 0x109   :  { %v872_v45 = vpack.c.bf16 %v380_v43, %v378_v40  ;;  %v912_v46 = vpack.c.bf16 %v420_v44, %v418_v41 }
 0x10b   :  { %1004 = vst [vmem:[%s1363_s3 + $0x30] sm:$0xff] %v872_v45  }
 0x10c   :  { %1012 = vst [vmem:[%s1363_s3 + $0x70] sm:$0xff] %v912_v46  }
 0x10d   :  { %v459_v47 = vpop.f32.mrf.mxu2  ;;  %v499_v48 = vpop.f32.mrf.mxu3 }
 0x10e   :  { %v460_v51 = vadd.f32 %v1198_v42, %v459_v47  ;;  %v500_v52 = vadd.f32 %v1198_v42, %v499_v48  ;;  %v382_v53 = vpop.f32.mrf.mxu0  ;;  %v422_v54 = vpop.f32.mrf.mxu1 }
 0x10f   :  { %v383_v61 = vadd.f32 %v1198_v42, %v382_v53  ;;  %v423_v62 = vadd.f32 %v1198_v42, %v422_v54 }
 0x110   :  { %v952_v55 = vpack.c.bf16 %v460_v51, %v458_v49  ;;  %v992_v56 = vpack.c.bf16 %v500_v52, %v498_v50 }
 0x112   :  { %1020 = vst [vmem:[%s1363_s3 + $0xb0] sm:$0xff] %v952_v55  }
 0x113   :  { %1028 = vst [vmem:[%s1363_s3 + $0xf0] sm:$0xff] %v992_v56  }
 0x115   :  { %v462_v57 = vpop.f32.mrf.mxu2  ;;  %v502_v58 = vpop.f32.mrf.mxu3 }
 0x116   :  { %v384_v59 = vpop.f32.mrf.mxu0  ;;  %v424_v60 = vpop.f32.mrf.mxu1  ;;  %v463_v5 = vadd.f32 %v1198_v42, %v462_v57  ;;  %v503_v6 = vadd.f32 %v1198_v42, %v502_v58 }
 0x117   :  { %v385_v63 = vadd.f32 %v1198_v42, %v384_v59  ;;  %v425_v0 = vadd.f32 %v1198_v42, %v424_v60 }
 0x119   :  { %v877_v1 = vpack.c.bf16 %v385_v63, %v383_v61  ;;  %v917_v2 = vpack.c.bf16 %v425_v0, %v423_v62 }
 0x11b   :  { %1005 = vst [vmem:[%s1363_s3 + $0x38] sm:$0xff] %v877_v1  }
 0x11c   :  { %1013 = vst [vmem:[%s1363_s3 + $0x78] sm:$0xff] %v917_v2  }
 0x11d   :  { %v464_v3 = vpop.f32.mrf.mxu2  ;;  %v504_v4 = vpop.f32.mrf.mxu3 }
 0x11e   :  { %v465_v7 = vadd.f32 %v1198_v42, %v464_v3  ;;  %v505_v8 = vadd.f32 %v1198_v42, %v504_v4 }
 0x120   :  { %v957_v9 = vpack.c.bf16 %v465_v7, %v463_v5  ;;  %v997_v10 = vpack.c.bf16 %v505_v8, %v503_v6 }
 0x122   :  { %1021 = vst [vmem:[%s1363_s3 + $0xb8] sm:$0xff] %v957_v9  }
 0x123   :  { %1029 = vst [vmem:[%s1363_s3 + $0xf8] sm:$0xff] %v997_v10  }

// kernel: gcn_forward.5
= control target key start
LH: loop header
LB: loop body
LE: loop exit
PB: predicated region body
PF: predicated region fallthrough
CT: control target
= control target key end

     0   :  { %s1385_s1 = inlined_call_operand.vmem [shape: bf16[128,512], index: 1, kind: input, shape index: {}]   ;;  %s1386_s0 = inlined_call_operand.vmem [shape: bf16[128,128], index: 0, kind: input, shape index: {}]   ;;  %s1387_s2 = inlined_call_operand.vmem [shape: bf16[128,512], index: 2, kind: output, shape index: {}]  }
   0x1   :  { %v1004_v0 = vld [vmem:[%s1385_s1 + $0xe0] sm:$0xf]  ;;  %v1056_v1 = vld [vmem:[%s1385_s1 + $0xec] sm:$0xf0]  ;;  %v1054_v2 = vld [vmem:[%s1385_s1 + $0xe4] sm:$0xf] }
   0x2   :  { %v1005_v3 = vor.u32 %v1056_v1, %v1004_v0  ;;  %v1006_v4 = vld [vmem:[%s1385_s1 + $0xf0] sm:$0xf0]  ;;  %v1012_v5 = vld [vmem:[%s1385_s1 + $0xe8] sm:$0xf]  ;;  %v1057_v6 = vld [vmem:[%s1385_s1 + $0xf4] sm:$0xf0] }
   0x3   :  { %v1009_v7 = vor.u32 %v1054_v2, %v1006_v4  ;;  %v1013_v8 = vor.u32 %v1057_v6, %v1012_v5  ;;  %v1055_v9 = vld [vmem:[%s1385_s1 + $0xec] sm:$0xf]  ;;  %v1014_v10 = vld [vmem:[%s1385_s1 + $0xf8] sm:$0xf0]  ;;  %v988_v11 = vld [vmem:[%s1385_s1 + $0xc0] sm:$0xf] }
   0x4   :  { %399 = vmatpush.bf16.msra.mxu0 %v1005_v3  ;;  %v1017_v12 = vor.u32 %v1055_v9, %v1014_v10  ;;  %v1052_v13 = vld [vmem:[%s1385_s1 + $0xcc] sm:$0xf0]  ;;  %v1050_v14 = vld [vmem:[%s1385_s1 + $0xc4] sm:$0xf]  ;;  %v990_v15 = vld [vmem:[%s1385_s1 + $0xd0] sm:$0xf0] }
   0x5   :  { %448 = vmatpush.bf16.msra.mxu1 %v1009_v7  ;;  %497 = vmatpush.bf16.msra.mxu2 %v1013_v8  ;;  %v989_v16 = vor.u32 %v1052_v13, %v988_v11  ;;  %v993_v17 = vor.u32 %v1050_v14, %v990_v15  ;;  %v996_v18 = vld [vmem:[%s1385_s1 + $0xc8] sm:$0xf]  ;;  %v1053_v19 = vld [vmem:[%s1385_s1 + $0xd4] sm:$0xf0]  ;;  %v1051_v20 = vld [vmem:[%s1385_s1 + $0xcc] sm:$0xf] }
   0x6   :  { %546 = vmatpush.bf16.msra.mxu3 %v1017_v12  ;;  %v997_v21 = vor.u32 %v1053_v19, %v996_v18  ;;  %v998_v22 = vld [vmem:[%s1385_s1 + $0xd8] sm:$0xf0]  ;;  %v972_v23 = vld [vmem:[%s1385_s1 + $0xa0] sm:$0xf]  ;;  %v1048_v24 = vld [vmem:[%s1385_s1 + $0xac] sm:$0xf0] }
   0x7   :  { %v1001_v25 = vor.u32 %v1051_v20, %v998_v22  ;;  %v1046_v26 = vld [vmem:[%s1385_s1 + $0xa4] sm:$0xf]  ;;  %v974_v27 = vld [vmem:[%s1385_s1 + $0xb0] sm:$0xf0]  ;;  %v980_v28 = vld [vmem:[%s1385_s1 + $0xa8] sm:$0xf]  ;;  %v973_v29 = vor.u32 %v1048_v24, %v972_v23 }
   0x8   :  { %400 = vmatpush.bf16.msra.mxu0 %v989_v16  ;;  %v1049_v30 = vld [vmem:[%s1385_s1 + $0xb4] sm:$0xf0]  ;;  %v1047_v31 = vld [vmem:[%s1385_s1 + $0xac] sm:$0xf]  ;;  %v982_v32 = vld [vmem:[%s1385_s1 + $0xb8] sm:$0xf0]  ;;  %v977_v33 = vor.u32 %v1046_v26, %v974_v27 }
   0x9   :  { %449 = vmatpush.bf16.msra.mxu1 %v993_v17  ;;  %498 = vmatpush.bf16.msra.mxu2 %v997_v21  ;;  %v981_v34 = vor.u32 %v1049_v30, %v980_v28  ;;  %v956_v35 = vld [vmem:[%s1385_s1 + $0x80] sm:$0xf]  ;;  %v1044_v36 = vld [vmem:[%s1385_s1 + $0x8c] sm:$0xf0]  ;;  %v1042_v37 = vld [vmem:[%s1385_s1 + $0x84] sm:$0xf]  ;;  %v985_v38 = vor.u32 %v1047_v31, %v982_v32 }
   0xa   :  { %547 = vmatpush.bf16.msra.mxu3 %v1001_v25  ;;  %v958_v39 = vld [vmem:[%s1385_s1 + $0x90] sm:$0xf0]  ;;  %v964_v40 = vld [vmem:[%s1385_s1 + $0x88] sm:$0xf]  ;;  %v1045_v41 = vld [vmem:[%s1385_s1 + $0x94] sm:$0xf0]  ;;  %v957_v44 = vor.u32 %v1044_v36, %v956_v35 }
   0xb   :  { %v1043_v42 = vld [vmem:[%s1385_s1 + $0x8c] sm:$0xf]  ;;  %v966_v43 = vld [vmem:[%s1385_s1 + $0x98] sm:$0xf0]  ;;  %v961_v45 = vor.u32 %v1042_v37, %v958_v39  ;;  %v965_v46 = vor.u32 %v1045_v41, %v964_v40  ;;  %v940_v47 = vld [vmem:[%s1385_s1 + $0x60] sm:$0xf] }
   0xc   :  { %401 = vmatpush.bf16.msra.mxu0 %v973_v29  ;;  %v1040_v48 = vld [vmem:[%s1385_s1 + $0x6c] sm:$0xf0]  ;;  %v1038_v49 = vld [vmem:[%s1385_s1 + $0x64] sm:$0xf]  ;;  %v969_v50 = vor.u32 %v1043_v42, %v966_v43  ;;  %v942_v51 = vld [vmem:[%s1385_s1 + $0x70] sm:$0xf0] }
   0xd   :  { %450 = vmatpush.bf16.msra.mxu1 %v977_v33  ;;  %499 = vmatpush.bf16.msra.mxu2 %v981_v34  ;;  %v948_v52 = vld [vmem:[%s1385_s1 + $0x68] sm:$0xf]  ;;  %v1041_v53 = vld [vmem:[%s1385_s1 + $0x74] sm:$0xf0]  ;;  %v1039_v54 = vld [vmem:[%s1385_s1 + $0x6c] sm:$0xf]  ;;  %v941_v56 = vor.u32 %v1040_v48, %v940_v47  ;;  %v945_v57 = vor.u32 %v1038_v49, %v942_v51 }
   0xe   :  { %548 = vmatpush.bf16.msra.mxu3 %v985_v38  ;;  %v950_v55 = vld [vmem:[%s1385_s1 + $0x78] sm:$0xf0]  ;;  %v949_v58 = vor.u32 %v1041_v53, %v948_v52  ;;  %v924_v59 = vld [vmem:[%s1385_s1 + $0x40] sm:$0xf]  ;;  %v1036_v60 = vld [vmem:[%s1385_s1 + $0x4c] sm:$0xf0] }
   0xf   :  { %v1034_v61 = vld [vmem:[%s1385_s1 + $0x44] sm:$0xf]  ;;  %v953_v62 = vor.u32 %v1039_v54, %v950_v55  ;;  %v926_v63 = vld [vmem:[%s1385_s1 + $0x50] sm:$0xf0]  ;;  %v932_v0 = vld [vmem:[%s1385_s1 + $0x48] sm:$0xf]  ;;  %v925_v4 = vor.u32 %v1036_v60, %v924_v59 }
  0x10   :  { %402 = vmatpush.bf16.msra.mxu0 %v957_v44  ;;  %v1037_v1 = vld [vmem:[%s1385_s1 + $0x54] sm:$0xf0]  ;;  %v1035_v2 = vld [vmem:[%s1385_s1 + $0x4c] sm:$0xf]  ;;  %v934_v3 = vld [vmem:[%s1385_s1 + $0x58] sm:$0xf0]  ;;  %v929_v5 = vor.u32 %v1034_v61, %v926_v63 }
  0x11   :  { %451 = vmatpush.bf16.msra.mxu1 %v961_v45  ;;  %500 = vmatpush.bf16.msra.mxu2 %v965_v46  ;;  %v933_v6 = vor.u32 %v1037_v1, %v932_v0  ;;  %v908_v7 = vld [vmem:[%s1385_s1 + $0x20] sm:$0xf]  ;;  %v1032_v8 = vld [vmem:[%s1385_s1 + $0x2c] sm:$0xf0]  ;;  %v1030_v9 = vld [vmem:[%s1385_s1 + $0x24] sm:$0xf]  ;;  %v937_v10 = vor.u32 %v1035_v2, %v934_v3 }
  0x12   :  { %549 = vmatpush.bf16.msra.mxu3 %v969_v50  ;;  %v910_v11 = vld [vmem:[%s1385_s1 + $0x30] sm:$0xf0]  ;;  %v916_v12 = vld [vmem:[%s1385_s1 + $0x28] sm:$0xf]  ;;  %v1033_v13 = vld [vmem:[%s1385_s1 + $0x34] sm:$0xf0]  ;;  %v909_v16 = vor.u32 %v1032_v8, %v908_v7 }
  0x13   :  { %v1031_v14 = vld [vmem:[%s1385_s1 + $0x2c] sm:$0xf]  ;;  %v918_v15 = vld [vmem:[%s1385_s1 + $0x38] sm:$0xf0]  ;;  %v913_v17 = vor.u32 %v1030_v9, %v910_v11  ;;  %v917_v18 = vor.u32 %v1033_v13, %v916_v12  ;;  %v892_v19 = vld [vmem:[%s1385_s1] sm:$0xf] }
  0x14   :  { %403 = vmatpush.bf16.msra.mxu0 %v941_v56  ;;  %v1028_v20 = vld [vmem:[%s1385_s1 + $0xc] sm:$0xf0]  ;;  %v1026_v21 = vld [vmem:[%s1385_s1 + $0x4] sm:$0xf]  ;;  %v921_v22 = vor.u32 %v1031_v14, %v918_v15  ;;  %v894_v23 = vld [vmem:[%s1385_s1 + $0x10] sm:$0xf0] }
  0x15   :  { %452 = vmatpush.bf16.msra.mxu1 %v945_v57  ;;  %501 = vmatpush.bf16.msra.mxu2 %v949_v58  ;;  %v900_v24 = vld [vmem:[%s1385_s1 + $0x8] sm:$0xf]  ;;  %v1029_v25 = vld [vmem:[%s1385_s1 + $0x14] sm:$0xf0]  ;;  %v1027_v26 = vld [vmem:[%s1385_s1 + $0xc] sm:$0xf]  ;;  %v893_v28 = vor.u32 %v1028_v20, %v892_v19  ;;  %v897_v29 = vor.u32 %v1026_v21, %v894_v23 }
  0x16   :  { %550 = vmatpush.bf16.msra.mxu3 %v953_v62  ;;  %v902_v27 = vld [vmem:[%s1385_s1 + $0x18] sm:$0xf0]  ;;  %v901_v30 = vor.u32 %v1029_v25, %v900_v24  ;;  %v1018_v32 = vld [vmem:[%s1386_s0] sm:$0xff]  ;;  %v1019_v33 = vld [vmem:[%s1386_s0 + $0x8] sm:$0xff] }
  0x17   :  { %v905_v31 = vor.u32 %v1027_v26, %v902_v27  ;;  %v1020_v34 = vld [vmem:[%s1386_s0 + $0x10] sm:$0xff]  ;;  %v1021_v35 = vld [vmem:[%s1386_s0 + $0x18] sm:$0xff]  ;;  %v1022_v36 = vld [vmem:[%s1386_s0 + $0x20] sm:$0xff] }
  0x18   :  { %404 = vmatpush.bf16.msra.mxu0 %v925_v4  ;;  %v1023_v37 = vld [vmem:[%s1386_s0 + $0x28] sm:$0xff]  ;;  %v1024_v38 = vld [vmem:[%s1386_s0 + $0x30] sm:$0xff]  ;;  %v1025_v39 = vld [vmem:[%s1386_s0 + $0x38] sm:$0xff] }
  0x19   :  { %453 = vmatpush.bf16.msra.mxu1 %v929_v5  ;;  %502 = vmatpush.bf16.msra.mxu2 %v933_v6 }
  0x1a   :  { %551 = vmatpush.bf16.msra.mxu3 %v937_v10 }
  0x1c   :  { %405 = vmatpush.bf16.msra.mxu0 %v909_v16 }
  0x1d   :  { %454 = vmatpush.bf16.msra.mxu1 %v913_v17  ;;  %503 = vmatpush.bf16.msra.mxu2 %v917_v18 }
  0x1e   :  { %552 = vmatpush.bf16.msra.mxu3 %v921_v22 }
  0x20   :  { %406 = vmatpush.bf16.msra.mxu0 %v893_v28 }
  0x21   :  { %455 = vmatpush.bf16.msra.mxu1 %v897_v29  ;;  %504 = vmatpush.bf16.msra.mxu2 %v901_v30 }
  0x22   :  { %553 = vmatpush.bf16.msra.mxu3 %v905_v31 }
  0x23   :  { %407 = vmatmul.bf16.vlgmr.msra.gmra.mxu0 %v1018_v32 }
  0x24   :  { %456 = vmatmul.bf16.vlgmr.msra.gmra.mxu1 %v1018_v32  ;;  %505 = vmatmul.bf16.vlgmr.msra.gmra.mxu2 %v1018_v32 }
  0x25   :  { %554 = vmatmul.bf16.vlgmr.msra.gmra.mxu3 %v1018_v32 }
  0x33   :  { %412 = vmatmul.bf16.gmra.mxu0 %v1019_v33 }
  0x34   :  { %461 = vmatmul.bf16.gmra.mxu1 %v1019_v33  ;;  %510 = vmatmul.bf16.gmra.mxu2 %v1019_v33 }
  0x35   :  { %559 = vmatmul.bf16.gmra.mxu3 %v1019_v33 }
  0x43   :  { %417 = vmatmul.bf16.gmra.mxu0 %v1020_v34 }
  0x44   :  { %466 = vmatmul.bf16.gmra.mxu1 %v1020_v34  ;;  %515 = vmatmul.bf16.gmra.mxu2 %v1020_v34 }
  0x45   :  { %564 = vmatmul.bf16.gmra.mxu3 %v1020_v34 }
  0x53   :  { %422 = vmatmul.bf16.gmra.mxu0 %v1021_v35 }
  0x54   :  { %471 = vmatmul.bf16.gmra.mxu1 %v1021_v35  ;;  %520 = vmatmul.bf16.gmra.mxu2 %v1021_v35 }
  0x55   :  { %569 = vmatmul.bf16.gmra.mxu3 %v1021_v35 }
  0x63   :  { %427 = vmatmul.bf16.gmra.mxu0 %v1022_v36 }
  0x64   :  { %476 = vmatmul.bf16.gmra.mxu1 %v1022_v36  ;;  %525 = vmatmul.bf16.gmra.mxu2 %v1022_v36 }
  0x65   :  { %574 = vmatmul.bf16.gmra.mxu3 %v1022_v36 }
  0x73   :  { %432 = vmatmul.bf16.gmra.mxu0 %v1023_v37 }
  0x74   :  { %481 = vmatmul.bf16.gmra.mxu1 %v1023_v37  ;;  %530 = vmatmul.bf16.gmra.mxu2 %v1023_v37 }
  0x75   :  { %579 = vmatmul.bf16.gmra.mxu3 %v1023_v37 }
  0x83   :  { %437 = vmatmul.bf16.gmra.mxu0 %v1024_v38 }
  0x84   :  { %486 = vmatmul.bf16.gmra.mxu1 %v1024_v38  ;;  %535 = vmatmul.bf16.gmra.mxu2 %v1024_v38 }
  0x85   :  { %584 = vmatmul.bf16.gmra.mxu3 %v1024_v38 }
  0x93   :  { %442 = vmatmul.bf16.gmra.mxu0 %v1025_v39 }
  0x94   :  { %491 = vmatmul.bf16.gmra.mxu1 %v1025_v39  ;;  %540 = vmatmul.bf16.gmra.mxu2 %v1025_v39 }
  0x95   :  { %589 = vmatmul.bf16.gmra.mxu3 %v1025_v39 }
  0xa0   :  { %v408_v40 = vpop.f32.mrf.mxu0 }
  0xa1   :  { %v457_v41 = vpop.f32.mrf.mxu1 }
  0xa2   :  { %v790_v42 = vpack.c.bf16 %v457_v41, %v408_v40 }
  0xa4   :  { %822 = vst [vmem:[%s1387_s2] sm:$0xff] %v790_v42 }
  0xa7   :  { %v506_v43 = vpop.f32.mrf.mxu2 }
  0xa8   :  { %v555_v44 = vpop.f32.mrf.mxu3  ;;  %v410_v45 = vpop.f32.mrf.mxu0 }
  0xa9   :  { %v791_v46 = vpack.c.bf16 %v555_v44, %v506_v43  ;;  %v459_v47 = vpop.f32.mrf.mxu1 }
  0xaa   :  { %v792_v48 = vpack.c.bf16 %v459_v47, %v410_v45 }
  0xab   :  { %823 = vst [vmem:[%s1387_s2 + $0x8] sm:$0xff] %v791_v46 }
  0xac   :  { %824 = vst [vmem:[%s1387_s2 + $0x10] sm:$0xff] %v792_v48 }
  0xaf   :  { %v508_v49 = vpop.f32.mrf.mxu2 }
  0xb0   :  { %v557_v50 = vpop.f32.mrf.mxu3  ;;  %v413_v51 = vpop.f32.mrf.mxu0 }
  0xb1   :  { %v793_v52 = vpack.c.bf16 %v557_v50, %v508_v49  ;;  %v462_v53 = vpop.f32.mrf.mxu1 }
  0xb2   :  { %v794_v54 = vpack.c.bf16 %v462_v53, %v413_v51 }
  0xb3   :  { %825 = vst [vmem:[%s1387_s2 + $0x18] sm:$0xff] %v793_v52 }
  0xb4   :  { %826 = vst [vmem:[%s1387_s2 + $0x20] sm:$0xff] %v794_v54 }
  0xb7   :  { %v511_v55 = vpop.f32.mrf.mxu2 }
  0xb8   :  { %v560_v56 = vpop.f32.mrf.mxu3  ;;  %v415_v57 = vpop.f32.mrf.mxu0 }
  0xb9   :  { %v795_v58 = vpack.c.bf16 %v560_v56, %v511_v55  ;;  %v464_v59 = vpop.f32.mrf.mxu1 }
  0xba   :  { %v796_v60 = vpack.c.bf16 %v464_v59, %v415_v57 }
  0xbb   :  { %827 = vst [vmem:[%s1387_s2 + $0x28] sm:$0xff] %v795_v58 }
  0xbc   :  { %828 = vst [vmem:[%s1387_s2 + $0x30] sm:$0xff] %v796_v60 }
  0xbf   :  { %v513_v61 = vpop.f32.mrf.mxu2 }
  0xc0   :  { %v562_v62 = vpop.f32.mrf.mxu3  ;;  %v418_v63 = vpop.f32.mrf.mxu0 }
  0xc1   :  { %v797_v0 = vpack.c.bf16 %v562_v62, %v513_v61  ;;  %v467_v1 = vpop.f32.mrf.mxu1 }
  0xc2   :  { %v798_v2 = vpack.c.bf16 %v467_v1, %v418_v63 }
  0xc3   :  { %829 = vst [vmem:[%s1387_s2 + $0x38] sm:$0xff] %v797_v0 }
  0xc4   :  { %830 = vst [vmem:[%s1387_s2 + $0x40] sm:$0xff] %v798_v2 }
  0xc7   :  { %v516_v3 = vpop.f32.mrf.mxu2 }
  0xc8   :  { %v565_v4 = vpop.f32.mrf.mxu3  ;;  %v420_v5 = vpop.f32.mrf.mxu0 }
  0xc9   :  { %v799_v6 = vpack.c.bf16 %v565_v4, %v516_v3  ;;  %v469_v7 = vpop.f32.mrf.mxu1 }
  0xca   :  { %v800_v8 = vpack.c.bf16 %v469_v7, %v420_v5 }
  0xcb   :  { %831 = vst [vmem:[%s1387_s2 + $0x48] sm:$0xff] %v799_v6 }
  0xcc   :  { %832 = vst [vmem:[%s1387_s2 + $0x50] sm:$0xff] %v800_v8 }
  0xcf   :  { %v518_v9 = vpop.f32.mrf.mxu2 }
  0xd0   :  { %v567_v10 = vpop.f32.mrf.mxu3  ;;  %v423_v11 = vpop.f32.mrf.mxu0 }
  0xd1   :  { %v801_v12 = vpack.c.bf16 %v567_v10, %v518_v9  ;;  %v472_v13 = vpop.f32.mrf.mxu1 }
  0xd2   :  { %v802_v14 = vpack.c.bf16 %v472_v13, %v423_v11 }
  0xd3   :  { %833 = vst [vmem:[%s1387_s2 + $0x58] sm:$0xff] %v801_v12 }
  0xd4   :  { %834 = vst [vmem:[%s1387_s2 + $0x60] sm:$0xff] %v802_v14 }
  0xd7   :  { %v521_v15 = vpop.f32.mrf.mxu2 }
  0xd8   :  { %v570_v16 = vpop.f32.mrf.mxu3  ;;  %v425_v17 = vpop.f32.mrf.mxu0 }
  0xd9   :  { %v803_v18 = vpack.c.bf16 %v570_v16, %v521_v15  ;;  %v474_v19 = vpop.f32.mrf.mxu1 }
  0xda   :  { %v804_v20 = vpack.c.bf16 %v474_v19, %v425_v17 }
  0xdb   :  { %835 = vst [vmem:[%s1387_s2 + $0x68] sm:$0xff] %v803_v18 }
  0xdc   :  { %836 = vst [vmem:[%s1387_s2 + $0x70] sm:$0xff] %v804_v20 }
  0xdf   :  { %v523_v21 = vpop.f32.mrf.mxu2 }
  0xe0   :  { %v572_v22 = vpop.f32.mrf.mxu3  ;;  %v428_v23 = vpop.f32.mrf.mxu0 }
  0xe1   :  { %v805_v24 = vpack.c.bf16 %v572_v22, %v523_v21  ;;  %v477_v25 = vpop.f32.mrf.mxu1 }
  0xe2   :  { %v806_v26 = vpack.c.bf16 %v477_v25, %v428_v23 }
  0xe3   :  { %837 = vst [vmem:[%s1387_s2 + $0x78] sm:$0xff] %v805_v24 }
  0xe4   :  { %838 = vst [vmem:[%s1387_s2 + $0x80] sm:$0xff] %v806_v26 }
  0xe7   :  { %v526_v27 = vpop.f32.mrf.mxu2 }
  0xe8   :  { %v575_v28 = vpop.f32.mrf.mxu3  ;;  %v430_v29 = vpop.f32.mrf.mxu0 }
  0xe9   :  { %v807_v30 = vpack.c.bf16 %v575_v28, %v526_v27  ;;  %v479_v31 = vpop.f32.mrf.mxu1 }
  0xea   :  { %v808_v32 = vpack.c.bf16 %v479_v31, %v430_v29 }
  0xeb   :  { %839 = vst [vmem:[%s1387_s2 + $0x88] sm:$0xff] %v807_v30 }
  0xec   :  { %840 = vst [vmem:[%s1387_s2 + $0x90] sm:$0xff] %v808_v32 }
  0xef   :  { %v528_v33 = vpop.f32.mrf.mxu2 }
  0xf0   :  { %v577_v34 = vpop.f32.mrf.mxu3  ;;  %v433_v35 = vpop.f32.mrf.mxu0 }
  0xf1   :  { %v809_v36 = vpack.c.bf16 %v577_v34, %v528_v33  ;;  %v482_v37 = vpop.f32.mrf.mxu1 }
  0xf2   :  { %v810_v38 = vpack.c.bf16 %v482_v37, %v433_v35 }
  0xf3   :  { %841 = vst [vmem:[%s1387_s2 + $0x98] sm:$0xff] %v809_v36 }
  0xf4   :  { %842 = vst [vmem:[%s1387_s2 + $0xa0] sm:$0xff] %v810_v38 }
  0xf7   :  { %v531_v39 = vpop.f32.mrf.mxu2 }
  0xf8   :  { %v580_v40 = vpop.f32.mrf.mxu3  ;;  %v435_v41 = vpop.f32.mrf.mxu0 }
  0xf9   :  { %v811_v42 = vpack.c.bf16 %v580_v40, %v531_v39  ;;  %v484_v43 = vpop.f32.mrf.mxu1 }
  0xfa   :  { %v812_v44 = vpack.c.bf16 %v484_v43, %v435_v41 }
  0xfb   :  { %843 = vst [vmem:[%s1387_s2 + $0xa8] sm:$0xff] %v811_v42 }
  0xfc   :  { %844 = vst [vmem:[%s1387_s2 + $0xb0] sm:$0xff] %v812_v44 }
  0xff   :  { %v533_v45 = vpop.f32.mrf.mxu2 }
 0x100   :  { %v582_v46 = vpop.f32.mrf.mxu3  ;;  %v438_v47 = vpop.f32.mrf.mxu0 }
 0x101   :  { %v813_v48 = vpack.c.bf16 %v582_v46, %v533_v45  ;;  %v487_v49 = vpop.f32.mrf.mxu1 }
 0x102   :  { %v814_v50 = vpack.c.bf16 %v487_v49, %v438_v47 }
 0x103   :  { %845 = vst [vmem:[%s1387_s2 + $0xb8] sm:$0xff] %v813_v48 }
 0x104   :  { %846 = vst [vmem:[%s1387_s2 + $0xc0] sm:$0xff] %v814_v50 }
 0x107   :  { %v536_v51 = vpop.f32.mrf.mxu2 }
 0x108   :  { %v585_v52 = vpop.f32.mrf.mxu3  ;;  %v440_v53 = vpop.f32.mrf.mxu0 }
 0x109   :  { %v815_v54 = vpack.c.bf16 %v585_v52, %v536_v51  ;;  %v489_v55 = vpop.f32.mrf.mxu1 }
 0x10a   :  { %v816_v56 = vpack.c.bf16 %v489_v55, %v440_v53 }
 0x10b   :  { %847 = vst [vmem:[%s1387_s2 + $0xc8] sm:$0xff] %v815_v54 }
 0x10c   :  { %848 = vst [vmem:[%s1387_s2 + $0xd0] sm:$0xff] %v816_v56 }
 0x10f   :  { %v538_v57 = vpop.f32.mrf.mxu2 }
 0x110   :  { %v587_v58 = vpop.f32.mrf.mxu3  ;;  %v443_v59 = vpop.f32.mrf.mxu0 }
 0x111   :  { %v817_v60 = vpack.c.bf16 %v587_v58, %v538_v57  ;;  %v492_v61 = vpop.f32.mrf.mxu1 }
 0x112   :  { %v818_v62 = vpack.c.bf16 %v492_v61, %v443_v59 }
 0x113   :  { %849 = vst [vmem:[%s1387_s2 + $0xd8] sm:$0xff] %v817_v60 }
 0x114   :  { %850 = vst [vmem:[%s1387_s2 + $0xe0] sm:$0xff] %v818_v62 }
 0x117   :  { %v541_v63 = vpop.f32.mrf.mxu2 }
 0x118   :  { %v590_v0 = vpop.f32.mrf.mxu3  ;;  %v445_v1 = vpop.f32.mrf.mxu0 }
 0x119   :  { %v819_v2 = vpack.c.bf16 %v590_v0, %v541_v63  ;;  %v494_v3 = vpop.f32.mrf.mxu1 }
 0x11a   :  { %v820_v4 = vpack.c.bf16 %v494_v3, %v445_v1 }
 0x11b   :  { %851 = vst [vmem:[%s1387_s2 + $0xe8] sm:$0xff] %v819_v2 }
 0x11c   :  { %852 = vst [vmem:[%s1387_s2 + $0xf0] sm:$0xff] %v820_v4 }
 0x11f   :  { %v543_v5 = vpop.f32.mrf.mxu2 }
 0x120   :  { %v592_v6 = vpop.f32.mrf.mxu3 }
 0x121   :  { %v821_v7 = vpack.c.bf16 %v592_v6, %v543_v5 }
 0x123   :  { %853 = vst [vmem:[%s1387_s2 + $0xf8] sm:$0xff] %v821_v7 }

// kernel: gcn_forward.7
= control target key start
LH: loop header
LB: loop body
LE: loop exit
PB: predicated region body
PF: predicated region fallthrough
CT: control target
= control target key end

     0   :  { %s1481_s1 = inlined_call_operand.vmem [shape: bf16[128,512], index: 1, kind: input, shape index: {}]   ;;  %s1482_s0 = inlined_call_operand.vmem [shape: bf16[128,128], index: 0, kind: input, shape index: {}]   ;;  %s1483_s2 = inlined_call_operand.vmem [shape: f32[128,512], index: 2, kind: output, shape index: {}]  }
   0x1   :  { %v1004_v0 = vld [vmem:[%s1481_s1 + $0xe0] sm:$0xf]  ;;  %v1056_v1 = vld [vmem:[%s1481_s1 + $0xec] sm:$0xf0]  ;;  %v1054_v2 = vld [vmem:[%s1481_s1 + $0xe4] sm:$0xf] }
   0x2   :  { %v1005_v3 = vor.u32 %v1056_v1, %v1004_v0  ;;  %v1006_v4 = vld [vmem:[%s1481_s1 + $0xf0] sm:$0xf0]  ;;  %v1012_v5 = vld [vmem:[%s1481_s1 + $0xe8] sm:$0xf]  ;;  %v1057_v6 = vld [vmem:[%s1481_s1 + $0xf4] sm:$0xf0] }
   0x3   :  { %v1009_v7 = vor.u32 %v1054_v2, %v1006_v4  ;;  %v1013_v8 = vor.u32 %v1057_v6, %v1012_v5  ;;  %v1055_v9 = vld [vmem:[%s1481_s1 + $0xec] sm:$0xf]  ;;  %v1014_v10 = vld [vmem:[%s1481_s1 + $0xf8] sm:$0xf0]  ;;  %v988_v11 = vld [vmem:[%s1481_s1 + $0xc0] sm:$0xf] }
   0x4   :  { %399 = vmatpush.bf16.msra.mxu0 %v1005_v3  ;;  %v1017_v12 = vor.u32 %v1055_v9, %v1014_v10  ;;  %v1052_v13 = vld [vmem:[%s1481_s1 + $0xcc] sm:$0xf0]  ;;  %v1050_v14 = vld [vmem:[%s1481_s1 + $0xc4] sm:$0xf]  ;;  %v990_v15 = vld [vmem:[%s1481_s1 + $0xd0] sm:$0xf0] }
   0x5   :  { %448 = vmatpush.bf16.msra.mxu1 %v1009_v7  ;;  %497 = vmatpush.bf16.msra.mxu2 %v1013_v8  ;;  %v989_v16 = vor.u32 %v1052_v13, %v988_v11  ;;  %v993_v17 = vor.u32 %v1050_v14, %v990_v15  ;;  %v996_v18 = vld [vmem:[%s1481_s1 + $0xc8] sm:$0xf]  ;;  %v1053_v19 = vld [vmem:[%s1481_s1 + $0xd4] sm:$0xf0]  ;;  %v1051_v20 = vld [vmem:[%s1481_s1 + $0xcc] sm:$0xf] }
   0x6   :  { %546 = vmatpush.bf16.msra.mxu3 %v1017_v12  ;;  %v997_v21 = vor.u32 %v1053_v19, %v996_v18  ;;  %v998_v22 = vld [vmem:[%s1481_s1 + $0xd8] sm:$0xf0]  ;;  %v972_v23 = vld [vmem:[%s1481_s1 + $0xa0] sm:$0xf]  ;;  %v1048_v24 = vld [vmem:[%s1481_s1 + $0xac] sm:$0xf0] }
   0x7   :  { %v1001_v25 = vor.u32 %v1051_v20, %v998_v22  ;;  %v1046_v26 = vld [vmem:[%s1481_s1 + $0xa4] sm:$0xf]  ;;  %v974_v27 = vld [vmem:[%s1481_s1 + $0xb0] sm:$0xf0]  ;;  %v980_v28 = vld [vmem:[%s1481_s1 + $0xa8] sm:$0xf]  ;;  %v973_v29 = vor.u32 %v1048_v24, %v972_v23 }
   0x8   :  { %400 = vmatpush.bf16.msra.mxu0 %v989_v16  ;;  %v1049_v30 = vld [vmem:[%s1481_s1 + $0xb4] sm:$0xf0]  ;;  %v1047_v31 = vld [vmem:[%s1481_s1 + $0xac] sm:$0xf]  ;;  %v982_v32 = vld [vmem:[%s1481_s1 + $0xb8] sm:$0xf0]  ;;  %v977_v33 = vor.u32 %v1046_v26, %v974_v27 }
   0x9   :  { %449 = vmatpush.bf16.msra.mxu1 %v993_v17  ;;  %498 = vmatpush.bf16.msra.mxu2 %v997_v21  ;;  %v981_v34 = vor.u32 %v1049_v30, %v980_v28  ;;  %v956_v35 = vld [vmem:[%s1481_s1 + $0x80] sm:$0xf]  ;;  %v1044_v36 = vld [vmem:[%s1481_s1 + $0x8c] sm:$0xf0]  ;;  %v1042_v37 = vld [vmem:[%s1481_s1 + $0x84] sm:$0xf]  ;;  %v985_v38 = vor.u32 %v1047_v31, %v982_v32 }
   0xa   :  { %547 = vmatpush.bf16.msra.mxu3 %v1001_v25  ;;  %v958_v39 = vld [vmem:[%s1481_s1 + $0x90] sm:$0xf0]  ;;  %v964_v40 = vld [vmem:[%s1481_s1 + $0x88] sm:$0xf]  ;;  %v1045_v41 = vld [vmem:[%s1481_s1 + $0x94] sm:$0xf0]  ;;  %v957_v44 = vor.u32 %v1044_v36, %v956_v35 }
   0xb   :  { %v1043_v42 = vld [vmem:[%s1481_s1 + $0x8c] sm:$0xf]  ;;  %v966_v43 = vld [vmem:[%s1481_s1 + $0x98] sm:$0xf0]  ;;  %v961_v45 = vor.u32 %v1042_v37, %v958_v39  ;;  %v965_v46 = vor.u32 %v1045_v41, %v964_v40  ;;  %v940_v47 = vld [vmem:[%s1481_s1 + $0x60] sm:$0xf] }
   0xc   :  { %401 = vmatpush.bf16.msra.mxu0 %v973_v29  ;;  %v1040_v48 = vld [vmem:[%s1481_s1 + $0x6c] sm:$0xf0]  ;;  %v1038_v49 = vld [vmem:[%s1481_s1 + $0x64] sm:$0xf]  ;;  %v969_v50 = vor.u32 %v1043_v42, %v966_v43  ;;  %v942_v51 = vld [vmem:[%s1481_s1 + $0x70] sm:$0xf0] }
   0xd   :  { %450 = vmatpush.bf16.msra.mxu1 %v977_v33  ;;  %499 = vmatpush.bf16.msra.mxu2 %v981_v34  ;;  %v948_v52 = vld [vmem:[%s1481_s1 + $0x68] sm:$0xf]  ;;  %v1041_v53 = vld [vmem:[%s1481_s1 + $0x74] sm:$0xf0]  ;;  %v1039_v54 = vld [vmem:[%s1481_s1 + $0x6c] sm:$0xf]  ;;  %v941_v56 = vor.u32 %v1040_v48, %v940_v47  ;;  %v945_v57 = vor.u32 %v1038_v49, %v942_v51 }
   0xe   :  { %548 = vmatpush.bf16.msra.mxu3 %v985_v38  ;;  %v950_v55 = vld [vmem:[%s1481_s1 + $0x78] sm:$0xf0]  ;;  %v949_v58 = vor.u32 %v1041_v53, %v948_v52  ;;  %v924_v59 = vld [vmem:[%s1481_s1 + $0x40] sm:$0xf]  ;;  %v1036_v60 = vld [vmem:[%s1481_s1 + $0x4c] sm:$0xf0] }
   0xf   :  { %v1034_v61 = vld [vmem:[%s1481_s1 + $0x44] sm:$0xf]  ;;  %v953_v62 = vor.u32 %v1039_v54, %v950_v55  ;;  %v926_v63 = vld [vmem:[%s1481_s1 + $0x50] sm:$0xf0]  ;;  %v932_v0 = vld [vmem:[%s1481_s1 + $0x48] sm:$0xf]  ;;  %v925_v4 = vor.u32 %v1036_v60, %v924_v59 }
  0x10   :  { %402 = vmatpush.bf16.msra.mxu0 %v957_v44  ;;  %v1037_v1 = vld [vmem:[%s1481_s1 + $0x54] sm:$0xf0]  ;;  %v1035_v2 = vld [vmem:[%s1481_s1 + $0x4c] sm:$0xf]  ;;  %v934_v3 = vld [vmem:[%s1481_s1 + $0x58] sm:$0xf0]  ;;  %v929_v5 = vor.u32 %v1034_v61, %v926_v63 }
  0x11   :  { %451 = vmatpush.bf16.msra.mxu1 %v961_v45  ;;  %500 = vmatpush.bf16.msra.mxu2 %v965_v46  ;;  %v933_v6 = vor.u32 %v1037_v1, %v932_v0  ;;  %v908_v7 = vld [vmem:[%s1481_s1 + $0x20] sm:$0xf]  ;;  %v1032_v8 = vld [vmem:[%s1481_s1 + $0x2c] sm:$0xf0]  ;;  %v1030_v9 = vld [vmem:[%s1481_s1 + $0x24] sm:$0xf]  ;;  %v937_v10 = vor.u32 %v1035_v2, %v934_v3 }
  0x12   :  { %549 = vmatpush.bf16.msra.mxu3 %v969_v50  ;;  %v910_v11 = vld [vmem:[%s1481_s1 + $0x30] sm:$0xf0]  ;;  %v916_v12 = vld [vmem:[%s1481_s1 + $0x28] sm:$0xf]  ;;  %v1033_v13 = vld [vmem:[%s1481_s1 + $0x34] sm:$0xf0]  ;;  %v909_v16 = vor.u32 %v1032_v8, %v908_v7 }
  0x13   :  { %v1031_v14 = vld [vmem:[%s1481_s1 + $0x2c] sm:$0xf]  ;;  %v918_v15 = vld [vmem:[%s1481_s1 + $0x38] sm:$0xf0]  ;;  %v913_v17 = vor.u32 %v1030_v9, %v910_v11  ;;  %v917_v18 = vor.u32 %v1033_v13, %v916_v12  ;;  %v892_v19 = vld [vmem:[%s1481_s1] sm:$0xf] }
  0x14   :  { %403 = vmatpush.bf16.msra.mxu0 %v941_v56  ;;  %v1028_v20 = vld [vmem:[%s1481_s1 + $0xc] sm:$0xf0]  ;;  %v1026_v21 = vld [vmem:[%s1481_s1 + $0x4] sm:$0xf]  ;;  %v921_v22 = vor.u32 %v1031_v14, %v918_v15  ;;  %v894_v23 = vld [vmem:[%s1481_s1 + $0x10] sm:$0xf0] }
  0x15   :  { %452 = vmatpush.bf16.msra.mxu1 %v945_v57  ;;  %501 = vmatpush.bf16.msra.mxu2 %v949_v58  ;;  %v900_v24 = vld [vmem:[%s1481_s1 + $0x8] sm:$0xf]  ;;  %v1029_v25 = vld [vmem:[%s1481_s1 + $0x14] sm:$0xf0]  ;;  %v1027_v26 = vld [vmem:[%s1481_s1 + $0xc] sm:$0xf]  ;;  %v893_v28 = vor.u32 %v1028_v20, %v892_v19  ;;  %v897_v29 = vor.u32 %v1026_v21, %v894_v23 }
  0x16   :  { %550 = vmatpush.bf16.msra.mxu3 %v953_v62  ;;  %v902_v27 = vld [vmem:[%s1481_s1 + $0x18] sm:$0xf0]  ;;  %v901_v30 = vor.u32 %v1029_v25, %v900_v24  ;;  %v1018_v32 = vld [vmem:[%s1482_s0] sm:$0xff]  ;;  %v1019_v33 = vld [vmem:[%s1482_s0 + $0x8] sm:$0xff] }
  0x17   :  { %v905_v31 = vor.u32 %v1027_v26, %v902_v27  ;;  %v1020_v34 = vld [vmem:[%s1482_s0 + $0x10] sm:$0xff]  ;;  %v1021_v35 = vld [vmem:[%s1482_s0 + $0x18] sm:$0xff]  ;;  %v1022_v36 = vld [vmem:[%s1482_s0 + $0x20] sm:$0xff] }
  0x18   :  { %404 = vmatpush.bf16.msra.mxu0 %v925_v4  ;;  %v1023_v37 = vld [vmem:[%s1482_s0 + $0x28] sm:$0xff]  ;;  %v1024_v38 = vld [vmem:[%s1482_s0 + $0x30] sm:$0xff]  ;;  %v1025_v39 = vld [vmem:[%s1482_s0 + $0x38] sm:$0xff] }
  0x19   :  { %453 = vmatpush.bf16.msra.mxu1 %v929_v5  ;;  %502 = vmatpush.bf16.msra.mxu2 %v933_v6 }
  0x1a   :  { %551 = vmatpush.bf16.msra.mxu3 %v937_v10 }
  0x1c   :  { %405 = vmatpush.bf16.msra.mxu0 %v909_v16 }
  0x1d   :  { %454 = vmatpush.bf16.msra.mxu1 %v913_v17  ;;  %503 = vmatpush.bf16.msra.mxu2 %v917_v18 }
  0x1e   :  { %552 = vmatpush.bf16.msra.mxu3 %v921_v22 }
  0x20   :  { %406 = vmatpush.bf16.msra.mxu0 %v893_v28 }
  0x21   :  { %455 = vmatpush.bf16.msra.mxu1 %v897_v29  ;;  %504 = vmatpush.bf16.msra.mxu2 %v901_v30 }
  0x22   :  { %553 = vmatpush.bf16.msra.mxu3 %v905_v31 }
  0x23   :  { %407 = vmatmul.bf16.vlgmr.msra.gmra.mxu0 %v1018_v32 }
  0x24   :  { %456 = vmatmul.bf16.vlgmr.msra.gmra.mxu1 %v1018_v32  ;;  %505 = vmatmul.bf16.vlgmr.msra.gmra.mxu2 %v1018_v32 }
  0x25   :  { %554 = vmatmul.bf16.vlgmr.msra.gmra.mxu3 %v1018_v32 }
  0x33   :  { %412 = vmatmul.bf16.gmra.mxu0 %v1019_v33 }
  0x34   :  { %461 = vmatmul.bf16.gmra.mxu1 %v1019_v33  ;;  %510 = vmatmul.bf16.gmra.mxu2 %v1019_v33 }
  0x35   :  { %559 = vmatmul.bf16.gmra.mxu3 %v1019_v33 }
  0x43   :  { %417 = vmatmul.bf16.gmra.mxu0 %v1020_v34 }
  0x44   :  { %466 = vmatmul.bf16.gmra.mxu1 %v1020_v34  ;;  %515 = vmatmul.bf16.gmra.mxu2 %v1020_v34 }
  0x45   :  { %564 = vmatmul.bf16.gmra.mxu3 %v1020_v34 }
  0x53   :  { %422 = vmatmul.bf16.gmra.mxu0 %v1021_v35 }
  0x54   :  { %471 = vmatmul.bf16.gmra.mxu1 %v1021_v35  ;;  %520 = vmatmul.bf16.gmra.mxu2 %v1021_v35 }
  0x55   :  { %569 = vmatmul.bf16.gmra.mxu3 %v1021_v35 }
  0x63   :  { %427 = vmatmul.bf16.gmra.mxu0 %v1022_v36 }
  0x64   :  { %476 = vmatmul.bf16.gmra.mxu1 %v1022_v36  ;;  %525 = vmatmul.bf16.gmra.mxu2 %v1022_v36 }
  0x65   :  { %574 = vmatmul.bf16.gmra.mxu3 %v1022_v36 }
  0x73   :  { %432 = vmatmul.bf16.gmra.mxu0 %v1023_v37 }
  0x74   :  { %481 = vmatmul.bf16.gmra.mxu1 %v1023_v37  ;;  %530 = vmatmul.bf16.gmra.mxu2 %v1023_v37 }
  0x75   :  { %579 = vmatmul.bf16.gmra.mxu3 %v1023_v37 }
  0x83   :  { %437 = vmatmul.bf16.gmra.mxu0 %v1024_v38 }
  0x84   :  { %486 = vmatmul.bf16.gmra.mxu1 %v1024_v38  ;;  %535 = vmatmul.bf16.gmra.mxu2 %v1024_v38 }
  0x85   :  { %584 = vmatmul.bf16.gmra.mxu3 %v1024_v38 }
  0x93   :  { %442 = vmatmul.bf16.gmra.mxu0 %v1025_v39 }
  0x94   :  { %491 = vmatmul.bf16.gmra.mxu1 %v1025_v39  ;;  %540 = vmatmul.bf16.gmra.mxu2 %v1025_v39 }
  0x95   :  { %589 = vmatmul.bf16.gmra.mxu3 %v1025_v39 }
  0xa0   :  { %v408_v40 = vpop.f32.mrf.mxu0 }
  0xa1   :  { %790 = vst [vmem:[%s1483_s2] sm:$0xff] %v408_v40  ;;  %v457_v41 = vpop.f32.mrf.mxu1 }
  0xa2   :  { %791 = vst [vmem:[%s1483_s2 + $0x8] sm:$0xff] %v457_v41 }
  0xa7   :  { %v506_v42 = vpop.f32.mrf.mxu2 }
  0xa8   :  { %792 = vst [vmem:[%s1483_s2 + $0x10] sm:$0xff] %v506_v42  ;;  %v555_v43 = vpop.f32.mrf.mxu3  ;;  %v410_v44 = vpop.f32.mrf.mxu0 }
  0xa9   :  { %793 = vst [vmem:[%s1483_s2 + $0x18] sm:$0xff] %v555_v43  ;;  %v459_v45 = vpop.f32.mrf.mxu1 }
  0xaa   :  { %794 = vst [vmem:[%s1483_s2 + $0x20] sm:$0xff] %v410_v44 }
  0xab   :  { %795 = vst [vmem:[%s1483_s2 + $0x28] sm:$0xff] %v459_v45 }
  0xaf   :  { %v508_v46 = vpop.f32.mrf.mxu2 }
  0xb0   :  { %796 = vst [vmem:[%s1483_s2 + $0x30] sm:$0xff] %v508_v46  ;;  %v557_v47 = vpop.f32.mrf.mxu3  ;;  %v413_v48 = vpop.f32.mrf.mxu0 }
  0xb1   :  { %797 = vst [vmem:[%s1483_s2 + $0x38] sm:$0xff] %v557_v47  ;;  %v462_v49 = vpop.f32.mrf.mxu1 }
  0xb2   :  { %798 = vst [vmem:[%s1483_s2 + $0x40] sm:$0xff] %v413_v48 }
  0xb3   :  { %799 = vst [vmem:[%s1483_s2 + $0x48] sm:$0xff] %v462_v49 }
  0xb7   :  { %v511_v50 = vpop.f32.mrf.mxu2 }
  0xb8   :  { %800 = vst [vmem:[%s1483_s2 + $0x50] sm:$0xff] %v511_v50  ;;  %v560_v51 = vpop.f32.mrf.mxu3  ;;  %v415_v52 = vpop.f32.mrf.mxu0 }
  0xb9   :  { %801 = vst [vmem:[%s1483_s2 + $0x58] sm:$0xff] %v560_v51  ;;  %v464_v53 = vpop.f32.mrf.mxu1 }
  0xba   :  { %802 = vst [vmem:[%s1483_s2 + $0x60] sm:$0xff] %v415_v52 }
  0xbb   :  { %803 = vst [vmem:[%s1483_s2 + $0x68] sm:$0xff] %v464_v53 }
  0xbf   :  { %v513_v54 = vpop.f32.mrf.mxu2 }
  0xc0   :  { %804 = vst [vmem:[%s1483_s2 + $0x70] sm:$0xff] %v513_v54  ;;  %v562_v55 = vpop.f32.mrf.mxu3  ;;  %v418_v56 = vpop.f32.mrf.mxu0 }
  0xc1   :  { %805 = vst [vmem:[%s1483_s2 + $0x78] sm:$0xff] %v562_v55  ;;  %v467_v57 = vpop.f32.mrf.mxu1 }
  0xc2   :  { %806 = vst [vmem:[%s1483_s2 + $0x80] sm:$0xff] %v418_v56 }
  0xc3   :  { %807 = vst [vmem:[%s1483_s2 + $0x88] sm:$0xff] %v467_v57 }
  0xc7   :  { %v516_v58 = vpop.f32.mrf.mxu2 }
  0xc8   :  { %808 = vst [vmem:[%s1483_s2 + $0x90] sm:$0xff] %v516_v58  ;;  %v565_v59 = vpop.f32.mrf.mxu3  ;;  %v420_v60 = vpop.f32.mrf.mxu0 }
  0xc9   :  { %809 = vst [vmem:[%s1483_s2 + $0x98] sm:$0xff] %v565_v59  ;;  %v469_v61 = vpop.f32.mrf.mxu1 }
  0xca   :  { %810 = vst [vmem:[%s1483_s2 + $0xa0] sm:$0xff] %v420_v60 }
  0xcb   :  { %811 = vst [vmem:[%s1483_s2 + $0xa8] sm:$0xff] %v469_v61 }
  0xcf   :  { %v518_v62 = vpop.f32.mrf.mxu2 }
  0xd0   :  { %812 = vst [vmem:[%s1483_s2 + $0xb0] sm:$0xff] %v518_v62  ;;  %v567_v63 = vpop.f32.mrf.mxu3  ;;  %v423_v0 = vpop.f32.mrf.mxu0 }
  0xd1   :  { %813 = vst [vmem:[%s1483_s2 + $0xb8] sm:$0xff] %v567_v63  ;;  %v472_v1 = vpop.f32.mrf.mxu1 }
  0xd2   :  { %814 = vst [vmem:[%s1483_s2 + $0xc0] sm:$0xff] %v423_v0 }
  0xd3   :  { %815 = vst [vmem:[%s1483_s2 + $0xc8] sm:$0xff] %v472_v1 }
  0xd7   :  { %v521_v2 = vpop.f32.mrf.mxu2 }
  0xd8   :  { %816 = vst [vmem:[%s1483_s2 + $0xd0] sm:$0xff] %v521_v2  ;;  %v570_v3 = vpop.f32.mrf.mxu3  ;;  %v425_v4 = vpop.f32.mrf.mxu0 }
  0xd9   :  { %817 = vst [vmem:[%s1483_s2 + $0xd8] sm:$0xff] %v570_v3  ;;  %v474_v5 = vpop.f32.mrf.mxu1 }
  0xda   :  { %818 = vst [vmem:[%s1483_s2 + $0xe0] sm:$0xff] %v425_v4 }
  0xdb   :  { %819 = vst [vmem:[%s1483_s2 + $0xe8] sm:$0xff] %v474_v5 }
  0xdf   :  { %v523_v6 = vpop.f32.mrf.mxu2 }
  0xe0   :  { %820 = vst [vmem:[%s1483_s2 + $0xf0] sm:$0xff] %v523_v6  ;;  %v572_v7 = vpop.f32.mrf.mxu3  ;;  %v428_v8 = vpop.f32.mrf.mxu0 }
  0xe1   :  { %821 = vst [vmem:[%s1483_s2 + $0xf8] sm:$0xff] %v572_v7  ;;  %v477_v9 = vpop.f32.mrf.mxu1 }
  0xe2   :  { %822 = vst [vmem:[%s1483_s2 + $0x100] sm:$0xff] %v428_v8 }
  0xe3   :  { %823 = vst [vmem:[%s1483_s2 + $0x108] sm:$0xff] %v477_v9 }
  0xe7   :  { %v526_v10 = vpop.f32.mrf.mxu2 }
  0xe8   :  { %824 = vst [vmem:[%s1483_s2 + $0x110] sm:$0xff] %v526_v10  ;;  %v575_v11 = vpop.f32.mrf.mxu3  ;;  %v430_v12 = vpop.f32.mrf.mxu0 }
  0xe9   :  { %825 = vst [vmem:[%s1483_s2 + $0x118] sm:$0xff] %v575_v11  ;;  %v479_v13 = vpop.f32.mrf.mxu1 }
  0xea   :  { %826 = vst [vmem:[%s1483_s2 + $0x120] sm:$0xff] %v430_v12 }
  0xeb   :  { %827 = vst [vmem:[%s1483_s2 + $0x128] sm:$0xff] %v479_v13 }
  0xef   :  { %v528_v14 = vpop.f32.mrf.mxu2 }
  0xf0   :  { %828 = vst [vmem:[%s1483_s2 + $0x130] sm:$0xff] %v528_v14  ;;  %v577_v15 = vpop.f32.mrf.mxu3  ;;  %v433_v16 = vpop.f32.mrf.mxu0 }
  0xf1   :  { %829 = vst [vmem:[%s1483_s2 + $0x138] sm:$0xff] %v577_v15  ;;  %v482_v17 = vpop.f32.mrf.mxu1 }
  0xf2   :  { %830 = vst [vmem:[%s1483_s2 + $0x140] sm:$0xff] %v433_v16 }
  0xf3   :  { %831 = vst [vmem:[%s1483_s2 + $0x148] sm:$0xff] %v482_v17 }
  0xf7   :  { %v531_v18 = vpop.f32.mrf.mxu2 }
  0xf8   :  { %832 = vst [vmem:[%s1483_s2 + $0x150] sm:$0xff] %v531_v18  ;;  %v580_v19 = vpop.f32.mrf.mxu3  ;;  %v435_v20 = vpop.f32.mrf.mxu0 }
  0xf9   :  { %833 = vst [vmem:[%s1483_s2 + $0x158] sm:$0xff] %v580_v19  ;;  %v484_v21 = vpop.f32.mrf.mxu1 }
  0xfa   :  { %834 = vst [vmem:[%s1483_s2 + $0x160] sm:$0xff] %v435_v20 }
  0xfb   :  { %835 = vst [vmem:[%s1483_s2 + $0x168] sm:$0xff] %v484_v21 }
  0xff   :  { %v533_v22 = vpop.f32.mrf.mxu2 }
 0x100   :  { %836 = vst [vmem:[%s1483_s2 + $0x170] sm:$0xff] %v533_v22  ;;  %v582_v23 = vpop.f32.mrf.mxu3  ;;  %v438_v24 = vpop.f32.mrf.mxu0 }
 0x101   :  { %837 = vst [vmem:[%s1483_s2 + $0x178] sm:$0xff] %v582_v23  ;;  %v487_v25 = vpop.f32.mrf.mxu1 }
 0x102   :  { %838 = vst [vmem:[%s1483_s2 + $0x180] sm:$0xff] %v438_v24 }
 0x103   :  { %839 = vst [vmem:[%s1483_s2 + $0x188] sm:$0xff] %v487_v25 }
 0x107   :  { %v536_v26 = vpop.f32.mrf.mxu2 }
 0x108   :  { %840 = vst [vmem:[%s1483_s2 + $0x190] sm:$0xff] %v536_v26  ;;  %v585_v27 = vpop.f32.mrf.mxu3  ;;  %v440_v28 = vpop.f32.mrf.mxu0 }
 0x109   :  { %841 = vst [vmem:[%s1483_s2 + $0x198] sm:$0xff] %v585_v27  ;;  %v489_v29 = vpop.f32.mrf.mxu1 }
 0x10a   :  { %842 = vst [vmem:[%s1483_s2 + $0x1a0] sm:$0xff] %v440_v28 }
 0x10b   :  { %843 = vst [vmem:[%s1483_s2 + $0x1a8] sm:$0xff] %v489_v29 }
 0x10f   :  { %v538_v30 = vpop.f32.mrf.mxu2 }
 0x110   :  { %844 = vst [vmem:[%s1483_s2 + $0x1b0] sm:$0xff] %v538_v30  ;;  %v587_v31 = vpop.f32.mrf.mxu3  ;;  %v443_v32 = vpop.f32.mrf.mxu0 }
 0x111   :  { %845 = vst [vmem:[%s1483_s2 + $0x1b8] sm:$0xff] %v587_v31  ;;  %v492_v33 = vpop.f32.mrf.mxu1 }
 0x112   :  { %846 = vst [vmem:[%s1483_s2 + $0x1c0] sm:$0xff] %v443_v32 }
 0x113   :  { %847 = vst [vmem:[%s1483_s2 + $0x1c8] sm:$0xff] %v492_v33 }
 0x117   :  { %v541_v34 = vpop.f32.mrf.mxu2 }
 0x118   :  { %848 = vst [vmem:[%s1483_s2 + $0x1d0] sm:$0xff] %v541_v34  ;;  %v590_v35 = vpop.f32.mrf.mxu3  ;;  %v445_v36 = vpop.f32.mrf.mxu0 }
 0x119   :  { %849 = vst [vmem:[%s1483_s2 + $0x1d8] sm:$0xff] %v590_v35  ;;  %v494_v37 = vpop.f32.mrf.mxu1 }
 0x11a   :  { %850 = vst [vmem:[%s1483_s2 + $0x1e0] sm:$0xff] %v445_v36 }
 0x11b   :  { %851 = vst [vmem:[%s1483_s2 + $0x1e8] sm:$0xff] %v494_v37 }
 0x11f   :  { %v543_v38 = vpop.f32.mrf.mxu2 }
 0x120   :  { %852 = vst [vmem:[%s1483_s2 + $0x1f0] sm:$0xff] %v543_v38  ;;  %v592_v39 = vpop.f32.mrf.mxu3 }
 0x121   :  { %853 = vst [vmem:[%s1483_s2 + $0x1f8] sm:$0xff] %v592_v39 }

</bundles_post_ra>
